<compile_context>
chip_gen: v5e
topology: v5e:2x2
jax: 0.10.0
libtpu: 0.0.40
codegen_flags: <defaults>
</compile_context>

<pallas_src>
import math

import jax
import jax.numpy as jnp
from jax import lax
from jax.experimental import pallas as pl
from jax.experimental.pallas import tpu as pltpu


def _round_up(x, m):
    return ((x + m - 1) // m) * m


def _fast_sigmoid(x):
    # sigmoid(x) = 0.5 * (1 + tanh(0.5 * x))  -> a single EUP op per gate.
    return 0.5 * (jnp.tanh(0.5 * x) + 1.0)


# --------------------------------------------------------------------------- #
# Fused GRU layer kernel: per grid step, one big input-projection matmul over the
# whole time tile, then the serial hidden-to-hidden recurrence.
# Grid = (batch_blocks [parallel], time_blocks [arbitrary]); hidden state persists
# across time blocks in a VMEM scratch.
# --------------------------------------------------------------------------- #
def gru_layer_kernel(x_ref, len_ref, wih_ref, bih_ref, whh_ref, bhh_ref,
                     out_ref, hlast_ref, gi_scratch, h_scratch):
    """
    x_ref     : [tT, tB, Din] bf16  layer input tile (time-major)
    len_ref   : [tB, 1]       i32   valid sequence lengths
    wih_ref   : [Din, 3H]     bf16  stacked input weights  (gate order r, z, n)
    bih_ref   : [1, 3H]       f32
    whh_ref   : [H, 3H]       bf16  stacked hidden weights (gate order r, z, n)
    bhh_ref   : [1, 3H]       f32
    out_ref   : [tT, tB, H]   bf16  per-step hidden (input to the next layer)
    hlast_ref : [tB, H]       f32   final (length-masked) hidden state
    gi_scratch: [tT, tB, 3H]  f32   precomputed input gates for this time tile
    h_scratch : [tB, H]       f32   recurrent state carried across time blocks
    """
    tT, tB, din = x_ref.shape
    three_h = wih_ref.shape[1]
    H = three_h // 3

    t_blk = pl.program_id(1)
    n_t_blk = pl.num_programs(1)

    @pl.when(t_blk == 0)
    def _():
        h_scratch[...] = jnp.zeros_like(h_scratch)

    # Input projection for the whole time tile in a single MXU-friendly matmul
    # (M = tT*tB), accumulated in f32.  No HBM round trip for GI.
    x_flat = x_ref[...].reshape(tT * tB, din)
    gi_flat = jnp.dot(x_flat, wih_ref[...],
                      preferred_element_type=jnp.float32) + bih_ref[...]
    gi_scratch[...] = gi_flat.reshape(tT, tB, three_h)

    # Hoisted out of the recurrent loop: lengths, hidden weights/bias, tile offset.
    lens = len_ref[...]                        # [tB, 1] int32
    whh = whh_ref[...]                         # [H, 3H] bf16
    bhh = bhh_ref[...]                         # [1, 3H] f32
    t0 = t_blk * tT

    def step(lt, h):
        gi = gi_scratch[lt]                                            # [tB, 3H] f32
        gh = jnp.dot(h.astype(jnp.bfloat16), whh,
                     preferred_element_type=jnp.float32) + bhh         # [tB, 3H] f32

        r = _fast_sigmoid(gi[:, 0:H] + gh[:, 0:H])
        z = _fast_sigmoid(gi[:, H:2 * H] + gh[:, H:2 * H])
        n = jnp.tanh(gi[:, 2 * H:3 * H] + r * gh[:, 2 * H:3 * H])
        h_new = (1.0 - z) * n + z * h                                  # [tB, H] f32

        # pack_padded_sequence semantics: freeze hidden once t >= src_len.
        mask = (t0 + lt) < lens                                        # [tB, 1]
        h_next = jnp.where(mask, h_new, h)
        out_ref[lt] = h_next.astype(out_ref.dtype)
        return h_next

    # h carried in vregs; partial unroll keeps vreg/i-cache pressure bounded.
    h_final = lax.fori_loop(0, tT, step, h_scratch[...], unroll=min(tT, 8))
    h_scratch[...] = h_final

    @pl.when(t_blk == n_t_blk - 1)
    def _():
        hlast_ref[...] = h_final


def gru_layer(x, lens2d, w_ih_t, b_ih, w_hh_t, b_hh, *, time_tile, batch_tile):
    """x: [T_pad, B_pad, Din_pad] bf16. Returns (out bf16 [T_pad,B_pad,H_pad],
    h_last f32 [B_pad, H_pad])."""
    t_pad, b_pad, din_pad = x.shape
    three_h = w_hh_t.shape[1]
    h_pad = three_h // 3
    n_b = b_pad // batch_tile
    n_t = t_pad // time_tile

    grid_spec = pltpu.PrefetchScalarGridSpec(
        num_scalar_prefetch=0,
        grid=(n_b, n_t),
        in_specs=[
            pl.BlockSpec((time_tile, batch_tile, din_pad), lambda b, t: (t, b, 0)),
            pl.BlockSpec((batch_tile, 1), lambda b, t: (b, 0)),
            pl.BlockSpec((din_pad, three_h), lambda b, t: (0, 0)),   # resident W_ih
            pl.BlockSpec((1, three_h), lambda b, t: (0, 0)),         # resident b_ih
            pl.BlockSpec((h_pad, three_h), lambda b, t: (0, 0)),     # resident W_hh
            pl.BlockSpec((1, three_h), lambda b, t: (0, 0)),         # resident b_hh
        ],
        out_specs=(
            pl.BlockSpec((time_tile, batch_tile, h_pad), lambda b, t: (t, b, 0)),
            pl.BlockSpec((batch_tile, h_pad), lambda b, t: (b, 0)),
        ),
        scratch_shapes=[
            pltpu.VMEM((time_tile, batch_tile, three_h), jnp.float32),  # GI tile
            pltpu.VMEM((batch_tile, h_pad), jnp.float32),               # hidden state
        ],
    )

    out, h_last = pl.pallas_call(
        gru_layer_kernel,
        out_shape=(jax.ShapeDtypeStruct((t_pad, b_pad, h_pad), jnp.bfloat16),
                   jax.ShapeDtypeStruct((b_pad, h_pad), jnp.float32)),
        grid_spec=grid_spec,
        compiler_params=pltpu.CompilerParams(
            # Single-TC chips: n_b == 1 by default.  On v7x with large B, pass
            # batch_tile = b_pad // 2 so this parallel axis engages both cores.
            dimension_semantics=("parallel", "arbitrary"),
            # <= 48 MiB keeps double-buffering intact on v7x's 64 MiB VMEM and is
            # far below v5e/v6e's 128 MiB.
            vmem_limit_bytes=48 * 1024 * 1024),
    )(x, lens2d, w_ih_t, b_ih, w_hh_t, b_hh)
    return out, h_last


# --------------------------------------------------------------------------- #
# Parameter init (PyTorch layout) + packing into stacked/transposed/padded form.
# --------------------------------------------------------------------------- #
def _pack_gates(w, b, H, h_pad, din, din_pad):
    """w: (3H, din) torch layout, gate rows ordered (r, z, n); b: (3H,).
    Returns (w_t_padded bf16 (din_pad, 3*h_pad), b_padded f32 (1, 3*h_pad))."""
    w_t = jnp.zeros((din_pad, 3 * h_pad), jnp.float32)
    b_p = jnp.zeros((1, 3 * h_pad), jnp.float32)
    for g in range(3):
        w_t = w_t.at[:din, g * h_pad:g * h_pad + H].set(w[g * H:(g + 1) * H, :].T)
        b_p = b_p.at[0, g * h_pad:g * h_pad + H].set(b[g * H:(g + 1) * H])
    return w_t.astype(jnp.bfloat16), b_p


def init_encoder_params(key, vocab_size, embedding_dim, hidden_dim, num_layers):
    H = hidden_dim
    h_pad = _round_up(H, 128)
    e_pad = _round_up(embedding_dim, 128)     # pad E for the in-kernel matmul
    keys = jax.random.split(key, 1 + 4 * num_layers)
    emb = jax.random.normal(keys[0], (vocab_size, embedding_dim), jnp.float32)
    embedding = jnp.zeros((vocab_size, e_pad), jnp.float32).at[:, :embedding_dim].set(emb)
    k = 1.0 / math.sqrt(H)
    layers = []
    for l in range(num_layers):
        din = embedding_dim if l == 0 else H
        din_pad = e_pad if l == 0 else h_pad
        k1, k2, k3, k4 = keys[1 + 4 * l: 5 + 4 * l]
        w_ih = jax.random.uniform(k1, (3 * H, din), jnp.float32, -k, k)
        w_hh = jax.random.uniform(k2, (3 * H, H), jnp.float32, -k, k)
        b_ih = jax.random.uniform(k3, (3 * H,), jnp.float32, -k, k)
        b_hh = jax.random.uniform(k4, (3 * H,), jnp.float32, -k, k)
        w_ih_t, b_ih_p = _pack_gates(w_ih, b_ih, H, h_pad, din, din_pad)
        w_hh_t, b_hh_p = _pack_gates(w_hh, b_hh, H, h_pad, H, h_pad)
        layers.append((w_ih_t, b_ih_p, w_hh_t, b_hh_p))
    return embedding, layers


def encoder_forward(src, src_len, params, *, hidden_dim,
                    time_tile=None, batch_tile=None):
    """src: [B, T] int32; src_len: [B] int32. Returns hidden [num_layers, B, H]."""
    embedding, layers = params
    B, T = src.shape
    if batch_tile is None:
        # Single batch block (best for 1-TC v5e/v6e); multiple of 16 so bf16 tiles
        # are sublane-native.  For v7x with large B, pass batch_tile = b_pad // 2.
        batch_tile = _round_up(B, 16)
    b_pad = _round_up(B, batch_tile)
    if time_tile is None:
        time_tile = min(_round_up(T, 8), 64)
    t_pad = _round_up(T, time_tile)

    # Time-major embedding gather (avoids a [B,T,E]->[T,B,E] HBM transpose copy).
    x = jnp.take(embedding, src.T, axis=0).astype(jnp.bfloat16)     # [T, B, E_pad]
    x = jnp.pad(x, ((0, t_pad - T), (0, b_pad - B), (0, 0)))

    # Padded batch rows get length 0 => their hidden stays at zero.
    lens2d = jnp.zeros((b_pad, 1), jnp.int32).at[:B, 0].set(src_len.astype(jnp.int32))

    hiddens = []
    for (w_ih_t, b_ih_p, w_hh_t, b_hh_p) in layers:
        x, h_last = gru_layer(x, lens2d, w_ih_t, b_ih_p, w_hh_t, b_hh_p,
                              time_tile=time_tile, batch_tile=batch_tile)
        hiddens.append(h_last[:B, :hidden_dim])
        # TODO(synk): inter-layer dropout omitted (eval-mode semantics).
    return jnp.stack(hiddens, axis=0)                               # [L, B, H] f32


if __name__ == "__main__":
    # Small shapes consistent with the module.
    B, T = 2, 8
    vocab_size, embedding_dim, hidden_dim, num_layers = 50, 16, 32, 2

    key = jax.random.PRNGKey(0)
    k_param, k_src = jax.random.split(key)

    params = init_encoder_params(
        k_param, vocab_size, embedding_dim, hidden_dim, num_layers)

    src = jax.random.randint(k_src, (B, T), 0, vocab_size, dtype=jnp.int32)
    src_len = jnp.array([8, 5], dtype=jnp.int32)   # padded-sequence lengths (<= T)

    hidden = encoder_forward(src, src_len, params, hidden_dim=hidden_dim)
    hidden = jax.block_until_ready(hidden)
    assert hidden.shape == (num_layers, B, hidden_dim)
    assert bool(jnp.all(jnp.isfinite(hidden)))
    print("KERNEL_OK")
</pallas_src>

<mosaic_0001>
module attributes {stable_mosaic.version = 11 : i64} {
  func.func @gru_layer_kernel(%arg0: i32, %arg1: i32, %arg2: memref<8x16x128xbf16, #tpu.memory_space<vmem>>, %arg3: memref<16x1xi32, #tpu.memory_space<vmem>>, %arg4: memref<128x384xbf16, #tpu.memory_space<vmem>>, %arg5: memref<1x384xf32, #tpu.memory_space<vmem>>, %arg6: memref<128x384xbf16, #tpu.memory_space<vmem>>, %arg7: memref<1x384xf32, #tpu.memory_space<vmem>>, %arg8: memref<8x16x128xbf16, #tpu.memory_space<vmem>>, %arg9: memref<16x128xf32, #tpu.memory_space<vmem>>, %arg10: memref<8x16x384xf32, #tpu.memory_space<vmem>>, %arg11: memref<16x128xf32, #tpu.memory_space<vmem>>) attributes {dimension_semantics = [#tpu.dimension_semantics<parallel>, #tpu.dimension_semantics<arbitrary>], iteration_bounds = array<i64: 1, 1>, scalar_prefetch = 0 : i64, scratch_operands = 2 : i64, tpu.core_type = #tpu.core_type<tc>, window_params = [{transform_indices = @transform_0, window_bounds = array<i64: 8, 16, 128>}, {transform_indices = @transform_1, window_bounds = array<i64: 16, 1>}, {pipeline_mode = #tpu.pipeline_mode<synchronous>, transform_indices = @transform_2, window_bounds = array<i64: 128, 384>}, {pipeline_mode = #tpu.pipeline_mode<synchronous>, transform_indices = @transform_3, window_bounds = array<i64: 1, 384>}, {pipeline_mode = #tpu.pipeline_mode<synchronous>, transform_indices = @transform_4, window_bounds = array<i64: 128, 384>}, {pipeline_mode = #tpu.pipeline_mode<synchronous>, transform_indices = @transform_5, window_bounds = array<i64: 1, 384>}, {transform_indices = @transform_6, window_bounds = array<i64: 8, 16, 128>}, {transform_indices = @transform_7, window_bounds = array<i64: 16, 128>}]} {
    %c0_i32 = arith.constant 0 : i32
    %0 = arith.cmpi eq, %arg1, %c0_i32 : i32
    %1 = arith.extui %0 : i1 to i32
    %c0_i32_0 = arith.constant 0 : i32
    %2 = arith.cmpi ne, %1, %c0_i32_0 : i32
    scf.if %2 {
      %cst_120 = arith.constant 0.000000e+00 : f32
      %405 = vector.broadcast %cst_120 : f32 to vector<16x128xf32>
      %c0_121 = arith.constant 0 : index
      %c0_122 = arith.constant 0 : index
      %406 = vector.load %arg11[%c0_121, %c0_122] : memref<16x128xf32, #tpu.memory_space<vmem>>, vector<16x128xf32>
      tpu.vector_store %arg11[%c0_121, %c0_122], %405 {strides = array<i32>} : memref<16x128xf32, #tpu.memory_space<vmem>>, vector<16x128xf32>,
    } else {
    }
    %c0 = arith.constant 0 : index
    %c0_1 = arith.constant 0 : index
    %c0_2 = arith.constant 0 : index
    %3 = vector.load %arg2[%c0, %c0_1, %c0_2] : memref<8x16x128xbf16, #tpu.memory_space<vmem>>, vector<8x16x128xbf16>
    %4 = vector.shape_cast %3 : vector<8x16x128xbf16> to vector<128x128xbf16>
    %c0_3 = arith.constant 0 : index
    %c0_4 = arith.constant 0 : index
    %5 = vector.load %arg4[%c0_3, %c0_4] : memref<128x384xbf16, #tpu.memory_space<vmem>>, vector<128x384xbf16>
    %cst = arith.constant dense<0.000000e+00> : vector<128x384xf32>
    %6 = tpu.matmul %4, %5, %cst {dimension_numbers = #tpu.dot_dimension_numbers<[1], [0], [0], [1], [0, 0, 1, 1], [], []>} : vector<128x128xbf16>, vector<128x384xbf16>, vector<128x384xf32> -> vector<128x384xf32>
    %c0_5 = arith.constant 0 : index
    %c0_6 = arith.constant 0 : index
    %7 = vector.load %arg5[%c0_5, %c0_6] : memref<1x384xf32, #tpu.memory_space<vmem>>, vector<1x384xf32>
    %8 = vector.broadcast %7 : vector<1x384xf32> to vector<128x384xf32>
    %9 = arith.addf %6, %8 : vector<128x384xf32>
    %10 = vector.shape_cast %9 : vector<128x384xf32> to vector<8x16x384xf32>
    %c0_7 = arith.constant 0 : index
    %c0_8 = arith.constant 0 : index
    %c0_9 = arith.constant 0 : index
    %11 = vector.load %arg10[%c0_7, %c0_8, %c0_9] : memref<8x16x384xf32, #tpu.memory_space<vmem>>, vector<8x16x384xf32>
    tpu.vector_store %arg10[%c0_7, %c0_8, %c0_9], %10 {strides = array<i32>} : memref<8x16x384xf32, #tpu.memory_space<vmem>>, vector<8x16x384xf32>,
    %c0_10 = arith.constant 0 : index
    %c0_11 = arith.constant 0 : index
    %12 = vector.load %arg3[%c0_10, %c0_11] : memref<16x1xi32, #tpu.memory_space<vmem>>, vector<16x1xi32>
    %c0_12 = arith.constant 0 : index
    %c0_13 = arith.constant 0 : index
    %13 = vector.load %arg6[%c0_12, %c0_13] : memref<128x384xbf16, #tpu.memory_space<vmem>>, vector<128x384xbf16>
    %c0_14 = arith.constant 0 : index
    %c0_15 = arith.constant 0 : index
    %14 = vector.load %arg7[%c0_14, %c0_15] : memref<1x384xf32, #tpu.memory_space<vmem>>, vector<1x384xf32>
    %c8_i32 = arith.constant 8 : i32
    %15 = arith.muli %arg1, %c8_i32 : i32
    %c0_16 = arith.constant 0 : index
    %c0_17 = arith.constant 0 : index
    %16 = vector.load %arg11[%c0_16, %c0_17] : memref<16x128xf32, #tpu.memory_space<vmem>>, vector<16x128xf32>
    %c0_i32_18 = arith.constant 0 : i32
    %17 = arith.index_cast %c0_i32_18 : i32 to index
    %c0_19 = arith.constant 0 : index
    %c0_20 = arith.constant 0 : index
    %18 = vector.load %arg10[%17, %c0_19, %c0_20] : memref<8x16x384xf32, #tpu.memory_space<vmem>>, vector<1x16x384xf32>
    %19 = vector.shape_cast %18 : vector<1x16x384xf32> to vector<16x384xf32>
    %20 = arith.truncf %16 : vector<16x128xf32> to vector<16x128xbf16>
    %cst_21 = arith.constant dense<0.000000e+00> : vector<16x384xf32>
    %21 = tpu.matmul %20, %13, %cst_21 {dimension_numbers = #tpu.dot_dimension_numbers<[1], [0], [0], [1], [0, 0, 1, 1], [], []>} : vector<16x128xbf16>, vector<128x384xbf16>, vector<16x384xf32> -> vector<16x384xf32>
    %22 = vector.broadcast %14 : vector<1x384xf32> to vector<16x384xf32>
    %23 = arith.addf %21, %22 : vector<16x384xf32>
    %24 = vector.extract_strided_slice %19 {offsets = [0, 0], sizes = [16, 128], strides = [1, 1]} : vector<16x384xf32> to vector<16x128xf32>
    %25 = vector.extract_strided_slice %23 {offsets = [0, 0], sizes = [16, 128], strides = [1, 1]} : vector<16x384xf32> to vector<16x128xf32>
    %26 = arith.addf %24, %25 : vector<16x128xf32>
    %cst_22 = arith.constant 5.000000e-01 : f32
    %27 = vector.broadcast %cst_22 : f32 to vector<16x128xf32>
    %28 = arith.mulf %27, %26 : vector<16x128xf32>
    %29 = math.tanh %28 : vector<16x128xf32>
    %cst_23 = arith.constant 1.000000e+00 : f32
    %30 = vector.broadcast %cst_23 : f32 to vector<16x128xf32>
    %31 = arith.addf %29, %30 : vector<16x128xf32>
    %cst_24 = arith.constant 5.000000e-01 : f32
    %32 = vector.broadcast %cst_24 : f32 to vector<16x128xf32>
    %33 = arith.mulf %32, %31 : vector<16x128xf32>
    %34 = vector.extract_strided_slice %19 {offsets = [0, 128], sizes = [16, 128], strides = [1, 1]} : vector<16x384xf32> to vector<16x128xf32>
    %35 = vector.extract_strided_slice %23 {offsets = [0, 128], sizes = [16, 128], strides = [1, 1]} : vector<16x384xf32> to vector<16x128xf32>
    %36 = arith.addf %34, %35 : vector<16x128xf32>
    %cst_25 = arith.constant 5.000000e-01 : f32
    %37 = vector.broadcast %cst_25 : f32 to vector<16x128xf32>
    %38 = arith.mulf %37, %36 : vector<16x128xf32>
    %39 = math.tanh %38 : vector<16x128xf32>
    %cst_26 = arith.constant 1.000000e+00 : f32
    %40 = vector.broadcast %cst_26 : f32 to vector<16x128xf32>
    %41 = arith.addf %39, %40 : vector<16x128xf32>
    %cst_27 = arith.constant 5.000000e-01 : f32
    %42 = vector.broadcast %cst_27 : f32 to vector<16x128xf32>
    %43 = arith.mulf %42, %41 : vector<16x128xf32>
    %44 = vector.extract_strided_slice %19 {offsets = [0, 256], sizes = [16, 128], strides = [1, 1]} : vector<16x384xf32> to vector<16x128xf32>
    %45 = vector.extract_strided_slice %23 {offsets = [0, 256], sizes = [16, 128], strides = [1, 1]} : vector<16x384xf32> to vector<16x128xf32>
    %46 = arith.mulf %33, %45 : vector<16x128xf32>
    %47 = arith.addf %44, %46 : vector<16x128xf32>
    %48 = math.tanh %47 : vector<16x128xf32>
    %cst_28 = arith.constant 1.000000e+00 : f32
    %49 = vector.broadcast %cst_28 : f32 to vector<16x128xf32>
    %50 = arith.subf %49, %43 : vector<16x128xf32>
    %51 = arith.mulf %50, %48 : vector<16x128xf32>
    %52 = arith.mulf %43, %16 : vector<16x128xf32>
    %53 = arith.addf %51, %52 : vector<16x128xf32>
    %54 = arith.addi %15, %c0_i32_18 : i32
    %55 = vector.broadcast %54 : i32 to vector<16x1xi32>
    %56 = arith.cmpi slt, %55, %12 : vector<16x1xi32>
    %57 = vector.shape_cast %56 : vector<16x1xi1> to vector<16x1xi1>
    %58 = vector.broadcast %57 : vector<16x1xi1> to vector<16x128xi1>
    %59 = arith.select %58, %53, %16 : vector<16x128xi1>, vector<16x128xf32>
    %60 = arith.truncf %59 : vector<16x128xf32> to vector<16x128xbf16>
    %61 = arith.index_cast %c0_i32_18 : i32 to index
    %c0_29 = arith.constant 0 : index
    %c0_30 = arith.constant 0 : index
    %62 = vector.load %arg8[%61, %c0_29, %c0_30] : memref<8x16x128xbf16, #tpu.memory_space<vmem>>, vector<1x16x128xbf16>
    %63 = vector.shape_cast %62 : vector<1x16x128xbf16> to vector<16x128xbf16>
    %64 = vector.shape_cast %60 : vector<16x128xbf16> to vector<1x16x128xbf16>
    tpu.vector_store %arg8[%61, %c0_29, %c0_30], %64 {strides = array<i32>} : memref<8x16x128xbf16, #tpu.memory_space<vmem>>, vector<1x16x128xbf16>,
    %c1_i32 = arith.constant 1 : i32
    %65 = arith.index_cast %c1_i32 : i32 to index
    %c0_31 = arith.constant 0 : index
    %c0_32 = arith.constant 0 : index
    %66 = vector.load %arg10[%65, %c0_31, %c0_32] : memref<8x16x384xf32, #tpu.memory_space<vmem>>, vector<1x16x384xf32>
    %67 = vector.shape_cast %66 : vector<1x16x384xf32> to vector<16x384xf32>
    %68 = arith.truncf %59 : vector<16x128xf32> to vector<16x128xbf16>
    %cst_33 = arith.constant dense<0.000000e+00> : vector<16x384xf32>
    %69 = tpu.matmul %68, %13, %cst_33 {dimension_numbers = #tpu.dot_dimension_numbers<[1], [0], [0], [1], [0, 0, 1, 1], [], []>} : vector<16x128xbf16>, vector<128x384xbf16>, vector<16x384xf32> -> vector<16x384xf32>
    %70 = vector.broadcast %14 : vector<1x384xf32> to vector<16x384xf32>
    %71 = arith.addf %69, %70 : vector<16x384xf32>
    %72 = vector.extract_strided_slice %67 {offsets = [0, 0], sizes = [16, 128], strides = [1, 1]} : vector<16x384xf32> to vector<16x128xf32>
    %73 = vector.extract_strided_slice %71 {offsets = [0, 0], sizes = [16, 128], strides = [1, 1]} : vector<16x384xf32> to vector<16x128xf32>
    %74 = arith.addf %72, %73 : vector<16x128xf32>
    %cst_34 = arith.constant 5.000000e-01 : f32
    %75 = vector.broadcast %cst_34 : f32 to vector<16x128xf32>
    %76 = arith.mulf %75, %74 : vector<16x128xf32>
    %77 = math.tanh %76 : vector<16x128xf32>
    %cst_35 = arith.constant 1.000000e+00 : f32
    %78 = vector.broadcast %cst_35 : f32 to vector<16x128xf32>
    %79 = arith.addf %77, %78 : vector<16x128xf32>
    %cst_36 = arith.constant 5.000000e-01 : f32
    %80 = vector.broadcast %cst_36 : f32 to vector<16x128xf32>
    %81 = arith.mulf %80, %79 : vector<16x128xf32>
    %82 = vector.extract_strided_slice %67 {offsets = [0, 128], sizes = [16, 128], strides = [1, 1]} : vector<16x384xf32> to vector<16x128xf32>
    %83 = vector.extract_strided_slice %71 {offsets = [0, 128], sizes = [16, 128], strides = [1, 1]} : vector<16x384xf32> to vector<16x128xf32>
    %84 = arith.addf %82, %83 : vector<16x128xf32>
    %cst_37 = arith.constant 5.000000e-01 : f32
    %85 = vector.broadcast %cst_37 : f32 to vector<16x128xf32>
    %86 = arith.mulf %85, %84 : vector<16x128xf32>
    %87 = math.tanh %86 : vector<16x128xf32>
    %cst_38 = arith.constant 1.000000e+00 : f32
    %88 = vector.broadcast %cst_38 : f32 to vector<16x128xf32>
    %89 = arith.addf %87, %88 : vector<16x128xf32>
    %cst_39 = arith.constant 5.000000e-01 : f32
    %90 = vector.broadcast %cst_39 : f32 to vector<16x128xf32>
    %91 = arith.mulf %90, %89 : vector<16x128xf32>
    %92 = vector.extract_strided_slice %67 {offsets = [0, 256], sizes = [16, 128], strides = [1, 1]} : vector<16x384xf32> to vector<16x128xf32>
    %93 = vector.extract_strided_slice %71 {offsets = [0, 256], sizes = [16, 128], strides = [1, 1]} : vector<16x384xf32> to vector<16x128xf32>
    %94 = arith.mulf %81, %93 : vector<16x128xf32>
    %95 = arith.addf %92, %94 : vector<16x128xf32>
    %96 = math.tanh %95 : vector<16x128xf32>
    %cst_40 = arith.constant 1.000000e+00 : f32
    %97 = vector.broadcast %cst_40 : f32 to vector<16x128xf32>
    %98 = arith.subf %97, %91 : vector<16x128xf32>
    %99 = arith.mulf %98, %96 : vector<16x128xf32>
    %100 = arith.mulf %91, %59 : vector<16x128xf32>
    %101 = arith.addf %99, %100 : vector<16x128xf32>
    %102 = arith.addi %15, %c1_i32 : i32
    %103 = vector.broadcast %102 : i32 to vector<16x1xi32>
    %104 = arith.cmpi slt, %103, %12 : vector<16x1xi32>
    %105 = vector.shape_cast %104 : vector<16x1xi1> to vector<16x1xi1>
    %106 = vector.broadcast %105 : vector<16x1xi1> to vector<16x128xi1>
    %107 = arith.select %106, %101, %59 : vector<16x128xi1>, vector<16x128xf32>
    %108 = arith.truncf %107 : vector<16x128xf32> to vector<16x128xbf16>
    %109 = arith.index_cast %c1_i32 : i32 to index
    %c0_41 = arith.constant 0 : index
    %c0_42 = arith.constant 0 : index
    %110 = vector.load %arg8[%109, %c0_41, %c0_42] : memref<8x16x128xbf16, #tpu.memory_space<vmem>>, vector<1x16x128xbf16>
    %111 = vector.shape_cast %110 : vector<1x16x128xbf16> to vector<16x128xbf16>
    %112 = vector.shape_cast %108 : vector<16x128xbf16> to vector<1x16x128xbf16>
    tpu.vector_store %arg8[%109, %c0_41, %c0_42], %112 {strides = array<i32>} : memref<8x16x128xbf16, #tpu.memory_space<vmem>>, vector<1x16x128xbf16>,
    %c2_i32 = arith.constant 2 : i32
    %113 = arith.index_cast %c2_i32 : i32 to index
    %c0_43 = arith.constant 0 : index
    %c0_44 = arith.constant 0 : index
    %114 = vector.load %arg10[%113, %c0_43, %c0_44] : memref<8x16x384xf32, #tpu.memory_space<vmem>>, vector<1x16x384xf32>
    %115 = vector.shape_cast %114 : vector<1x16x384xf32> to vector<16x384xf32>
    %116 = arith.truncf %107 : vector<16x128xf32> to vector<16x128xbf16>
    %cst_45 = arith.constant dense<0.000000e+00> : vector<16x384xf32>
    %117 = tpu.matmul %116, %13, %cst_45 {dimension_numbers = #tpu.dot_dimension_numbers<[1], [0], [0], [1], [0, 0, 1, 1], [], []>} : vector<16x128xbf16>, vector<128x384xbf16>, vector<16x384xf32> -> vector<16x384xf32>
    %118 = vector.broadcast %14 : vector<1x384xf32> to vector<16x384xf32>
    %119 = arith.addf %117, %118 : vector<16x384xf32>
    %120 = vector.extract_strided_slice %115 {offsets = [0, 0], sizes = [16, 128], strides = [1, 1]} : vector<16x384xf32> to vector<16x128xf32>
    %121 = vector.extract_strided_slice %119 {offsets = [0, 0], sizes = [16, 128], strides = [1, 1]} : vector<16x384xf32> to vector<16x128xf32>
    %122 = arith.addf %120, %121 : vector<16x128xf32>
    %cst_46 = arith.constant 5.000000e-01 : f32
    %123 = vector.broadcast %cst_46 : f32 to vector<16x128xf32>
    %124 = arith.mulf %123, %122 : vector<16x128xf32>
    %125 = math.tanh %124 : vector<16x128xf32>
    %cst_47 = arith.constant 1.000000e+00 : f32
    %126 = vector.broadcast %cst_47 : f32 to vector<16x128xf32>
    %127 = arith.addf %125, %126 : vector<16x128xf32>
    %cst_48 = arith.constant 5.000000e-01 : f32
    %128 = vector.broadcast %cst_48 : f32 to vector<16x128xf32>
    %129 = arith.mulf %128, %127 : vector<16x128xf32>
    %130 = vector.extract_strided_slice %115 {offsets = [0, 128], sizes = [16, 128], strides = [1, 1]} : vector<16x384xf32> to vector<16x128xf32>
    %131 = vector.extract_strided_slice %119 {offsets = [0, 128], sizes = [16, 128], strides = [1, 1]} : vector<16x384xf32> to vector<16x128xf32>
    %132 = arith.addf %130, %131 : vector<16x128xf32>
    %cst_49 = arith.constant 5.000000e-01 : f32
    %133 = vector.broadcast %cst_49 : f32 to vector<16x128xf32>
    %134 = arith.mulf %133, %132 : vector<16x128xf32>
    %135 = math.tanh %134 : vector<16x128xf32>
    %cst_50 = arith.constant 1.000000e+00 : f32
    %136 = vector.broadcast %cst_50 : f32 to vector<16x128xf32>
    %137 = arith.addf %135, %136 : vector<16x128xf32>
    %cst_51 = arith.constant 5.000000e-01 : f32
    %138 = vector.broadcast %cst_51 : f32 to vector<16x128xf32>
    %139 = arith.mulf %138, %137 : vector<16x128xf32>
    %140 = vector.extract_strided_slice %115 {offsets = [0, 256], sizes = [16, 128], strides = [1, 1]} : vector<16x384xf32> to vector<16x128xf32>
    %141 = vector.extract_strided_slice %119 {offsets = [0, 256], sizes = [16, 128], strides = [1, 1]} : vector<16x384xf32> to vector<16x128xf32>
    %142 = arith.mulf %129, %141 : vector<16x128xf32>
    %143 = arith.addf %140, %142 : vector<16x128xf32>
    %144 = math.tanh %143 : vector<16x128xf32>
    %cst_52 = arith.constant 1.000000e+00 : f32
    %145 = vector.broadcast %cst_52 : f32 to vector<16x128xf32>
    %146 = arith.subf %145, %139 : vector<16x128xf32>
    %147 = arith.mulf %146, %144 : vector<16x128xf32>
    %148 = arith.mulf %139, %107 : vector<16x128xf32>
    %149 = arith.addf %147, %148 : vector<16x128xf32>
    %150 = arith.addi %15, %c2_i32 : i32
    %151 = vector.broadcast %150 : i32 to vector<16x1xi32>
    %152 = arith.cmpi slt, %151, %12 : vector<16x1xi32>
    %153 = vector.shape_cast %152 : vector<16x1xi1> to vector<16x1xi1>
    %154 = vector.broadcast %153 : vector<16x1xi1> to vector<16x128xi1>
    %155 = arith.select %154, %149, %107 : vector<16x128xi1>, vector<16x128xf32>
    %156 = arith.truncf %155 : vector<16x128xf32> to vector<16x128xbf16>
    %157 = arith.index_cast %c2_i32 : i32 to index
    %c0_53 = arith.constant 0 : index
    %c0_54 = arith.constant 0 : index
    %158 = vector.load %arg8[%157, %c0_53, %c0_54] : memref<8x16x128xbf16, #tpu.memory_space<vmem>>, vector<1x16x128xbf16>
    %159 = vector.shape_cast %158 : vector<1x16x128xbf16> to vector<16x128xbf16>
    %160 = vector.shape_cast %156 : vector<16x128xbf16> to vector<1x16x128xbf16>
    tpu.vector_store %arg8[%157, %c0_53, %c0_54], %160 {strides = array<i32>} : memref<8x16x128xbf16, #tpu.memory_space<vmem>>, vector<1x16x128xbf16>,
    %c3_i32 = arith.constant 3 : i32
    %161 = arith.index_cast %c3_i32 : i32 to index
    %c0_55 = arith.constant 0 : index
    %c0_56 = arith.constant 0 : index
    %162 = vector.load %arg10[%161, %c0_55, %c0_56] : memref<8x16x384xf32, #tpu.memory_space<vmem>>, vector<1x16x384xf32>
    %163 = vector.shape_cast %162 : vector<1x16x384xf32> to vector<16x384xf32>
    %164 = arith.truncf %155 : vector<16x128xf32> to vector<16x128xbf16>
    %cst_57 = arith.constant dense<0.000000e+00> : vector<16x384xf32>
    %165 = tpu.matmul %164, %13, %cst_57 {dimension_numbers = #tpu.dot_dimension_numbers<[1], [0], [0], [1], [0, 0, 1, 1], [], []>} : vector<16x128xbf16>, vector<128x384xbf16>, vector<16x384xf32> -> vector<16x384xf32>
    %166 = vector.broadcast %14 : vector<1x384xf32> to vector<16x384xf32>
    %167 = arith.addf %165, %166 : vector<16x384xf32>
    %168 = vector.extract_strided_slice %163 {offsets = [0, 0], sizes = [16, 128], strides = [1, 1]} : vector<16x384xf32> to vector<16x128xf32>
    %169 = vector.extract_strided_slice %167 {offsets = [0, 0], sizes = [16, 128], strides = [1, 1]} : vector<16x384xf32> to vector<16x128xf32>
    %170 = arith.addf %168, %169 : vector<16x128xf32>
    %cst_58 = arith.constant 5.000000e-01 : f32
    %171 = vector.broadcast %cst_58 : f32 to vector<16x128xf32>
    %172 = arith.mulf %171, %170 : vector<16x128xf32>
    %173 = math.tanh %172 : vector<16x128xf32>
    %cst_59 = arith.constant 1.000000e+00 : f32
    %174 = vector.broadcast %cst_59 : f32 to vector<16x128xf32>
    %175 = arith.addf %173, %174 : vector<16x128xf32>
    %cst_60 = arith.constant 5.000000e-01 : f32
    %176 = vector.broadcast %cst_60 : f32 to vector<16x128xf32>
    %177 = arith.mulf %176, %175 : vector<16x128xf32>
    %178 = vector.extract_strided_slice %163 {offsets = [0, 128], sizes = [16, 128], strides = [1, 1]} : vector<16x384xf32> to vector<16x128xf32>
    %179 = vector.extract_strided_slice %167 {offsets = [0, 128], sizes = [16, 128], strides = [1, 1]} : vector<16x384xf32> to vector<16x128xf32>
    %180 = arith.addf %178, %179 : vector<16x128xf32>
    %cst_61 = arith.constant 5.000000e-01 : f32
    %181 = vector.broadcast %cst_61 : f32 to vector<16x128xf32>
    %182 = arith.mulf %181, %180 : vector<16x128xf32>
    %183 = math.tanh %182 : vector<16x128xf32>
    %cst_62 = arith.constant 1.000000e+00 : f32
    %184 = vector.broadcast %cst_62 : f32 to vector<16x128xf32>
    %185 = arith.addf %183, %184 : vector<16x128xf32>
    %cst_63 = arith.constant 5.000000e-01 : f32
    %186 = vector.broadcast %cst_63 : f32 to vector<16x128xf32>
    %187 = arith.mulf %186, %185 : vector<16x128xf32>
    %188 = vector.extract_strided_slice %163 {offsets = [0, 256], sizes = [16, 128], strides = [1, 1]} : vector<16x384xf32> to vector<16x128xf32>
    %189 = vector.extract_strided_slice %167 {offsets = [0, 256], sizes = [16, 128], strides = [1, 1]} : vector<16x384xf32> to vector<16x128xf32>
    %190 = arith.mulf %177, %189 : vector<16x128xf32>
    %191 = arith.addf %188, %190 : vector<16x128xf32>
    %192 = math.tanh %191 : vector<16x128xf32>
    %cst_64 = arith.constant 1.000000e+00 : f32
    %193 = vector.broadcast %cst_64 : f32 to vector<16x128xf32>
    %194 = arith.subf %193, %187 : vector<16x128xf32>
    %195 = arith.mulf %194, %192 : vector<16x128xf32>
    %196 = arith.mulf %187, %155 : vector<16x128xf32>
    %197 = arith.addf %195, %196 : vector<16x128xf32>
    %198 = arith.addi %15, %c3_i32 : i32
    %199 = vector.broadcast %198 : i32 to vector<16x1xi32>
    %200 = arith.cmpi slt, %199, %12 : vector<16x1xi32>
    %201 = vector.shape_cast %200 : vector<16x1xi1> to vector<16x1xi1>
    %202 = vector.broadcast %201 : vector<16x1xi1> to vector<16x128xi1>
    %203 = arith.select %202, %197, %155 : vector<16x128xi1>, vector<16x128xf32>
    %204 = arith.truncf %203 : vector<16x128xf32> to vector<16x128xbf16>
    %205 = arith.index_cast %c3_i32 : i32 to index
    %c0_65 = arith.constant 0 : index
    %c0_66 = arith.constant 0 : index
    %206 = vector.load %arg8[%205, %c0_65, %c0_66] : memref<8x16x128xbf16, #tpu.memory_space<vmem>>, vector<1x16x128xbf16>
    %207 = vector.shape_cast %206 : vector<1x16x128xbf16> to vector<16x128xbf16>
    %208 = vector.shape_cast %204 : vector<16x128xbf16> to vector<1x16x128xbf16>
    tpu.vector_store %arg8[%205, %c0_65, %c0_66], %208 {strides = array<i32>} : memref<8x16x128xbf16, #tpu.memory_space<vmem>>, vector<1x16x128xbf16>,
    %c4_i32 = arith.constant 4 : i32
    %209 = arith.index_cast %c4_i32 : i32 to index
    %c0_67 = arith.constant 0 : index
    %c0_68 = arith.constant 0 : index
    %210 = vector.load %arg10[%209, %c0_67, %c0_68] : memref<8x16x384xf32, #tpu.memory_space<vmem>>, vector<1x16x384xf32>
    %211 = vector.shape_cast %210 : vector<1x16x384xf32> to vector<16x384xf32>
    %212 = arith.truncf %203 : vector<16x128xf32> to vector<16x128xbf16>
    %cst_69 = arith.constant dense<0.000000e+00> : vector<16x384xf32>
    %213 = tpu.matmul %212, %13, %cst_69 {dimension_numbers = #tpu.dot_dimension_numbers<[1], [0], [0], [1], [0, 0, 1, 1], [], []>} : vector<16x128xbf16>, vector<128x384xbf16>, vector<16x384xf32> -> vector<16x384xf32>
    %214 = vector.broadcast %14 : vector<1x384xf32> to vector<16x384xf32>
    %215 = arith.addf %213, %214 : vector<16x384xf32>
    %216 = vector.extract_strided_slice %211 {offsets = [0, 0], sizes = [16, 128], strides = [1, 1]} : vector<16x384xf32> to vector<16x128xf32>
    %217 = vector.extract_strided_slice %215 {offsets = [0, 0], sizes = [16, 128], strides = [1, 1]} : vector<16x384xf32> to vector<16x128xf32>
    %218 = arith.addf %216, %217 : vector<16x128xf32>
    %cst_70 = arith.constant 5.000000e-01 : f32
    %219 = vector.broadcast %cst_70 : f32 to vector<16x128xf32>
    %220 = arith.mulf %219, %218 : vector<16x128xf32>
    %221 = math.tanh %220 : vector<16x128xf32>
    %cst_71 = arith.constant 1.000000e+00 : f32
    %222 = vector.broadcast %cst_71 : f32 to vector<16x128xf32>
    %223 = arith.addf %221, %222 : vector<16x128xf32>
    %cst_72 = arith.constant 5.000000e-01 : f32
    %224 = vector.broadcast %cst_72 : f32 to vector<16x128xf32>
    %225 = arith.mulf %224, %223 : vector<16x128xf32>
    %226 = vector.extract_strided_slice %211 {offsets = [0, 128], sizes = [16, 128], strides = [1, 1]} : vector<16x384xf32> to vector<16x128xf32>
    %227 = vector.extract_strided_slice %215 {offsets = [0, 128], sizes = [16, 128], strides = [1, 1]} : vector<16x384xf32> to vector<16x128xf32>
    %228 = arith.addf %226, %227 : vector<16x128xf32>
    %cst_73 = arith.constant 5.000000e-01 : f32
    %229 = vector.broadcast %cst_73 : f32 to vector<16x128xf32>
    %230 = arith.mulf %229, %228 : vector<16x128xf32>
    %231 = math.tanh %230 : vector<16x128xf32>
    %cst_74 = arith.constant 1.000000e+00 : f32
    %232 = vector.broadcast %cst_74 : f32 to vector<16x128xf32>
    %233 = arith.addf %231, %232 : vector<16x128xf32>
    %cst_75 = arith.constant 5.000000e-01 : f32
    %234 = vector.broadcast %cst_75 : f32 to vector<16x128xf32>
    %235 = arith.mulf %234, %233 : vector<16x128xf32>
    %236 = vector.extract_strided_slice %211 {offsets = [0, 256], sizes = [16, 128], strides = [1, 1]} : vector<16x384xf32> to vector<16x128xf32>
    %237 = vector.extract_strided_slice %215 {offsets = [0, 256], sizes = [16, 128], strides = [1, 1]} : vector<16x384xf32> to vector<16x128xf32>
    %238 = arith.mulf %225, %237 : vector<16x128xf32>
    %239 = arith.addf %236, %238 : vector<16x128xf32>
    %240 = math.tanh %239 : vector<16x128xf32>
    %cst_76 = arith.constant 1.000000e+00 : f32
    %241 = vector.broadcast %cst_76 : f32 to vector<16x128xf32>
    %242 = arith.subf %241, %235 : vector<16x128xf32>
    %243 = arith.mulf %242, %240 : vector<16x128xf32>
    %244 = arith.mulf %235, %203 : vector<16x128xf32>
    %245 = arith.addf %243, %244 : vector<16x128xf32>
    %246 = arith.addi %15, %c4_i32 : i32
    %247 = vector.broadcast %246 : i32 to vector<16x1xi32>
    %248 = arith.cmpi slt, %247, %12 : vector<16x1xi32>
    %249 = vector.shape_cast %248 : vector<16x1xi1> to vector<16x1xi1>
    %250 = vector.broadcast %249 : vector<16x1xi1> to vector<16x128xi1>
    %251 = arith.select %250, %245, %203 : vector<16x128xi1>, vector<16x128xf32>
    %252 = arith.truncf %251 : vector<16x128xf32> to vector<16x128xbf16>
    %253 = arith.index_cast %c4_i32 : i32 to index
    %c0_77 = arith.constant 0 : index
    %c0_78 = arith.constant 0 : index
    %254 = vector.load %arg8[%253, %c0_77, %c0_78] : memref<8x16x128xbf16, #tpu.memory_space<vmem>>, vector<1x16x128xbf16>
    %255 = vector.shape_cast %254 : vector<1x16x128xbf16> to vector<16x128xbf16>
    %256 = vector.shape_cast %252 : vector<16x128xbf16> to vector<1x16x128xbf16>
    tpu.vector_store %arg8[%253, %c0_77, %c0_78], %256 {strides = array<i32>} : memref<8x16x128xbf16, #tpu.memory_space<vmem>>, vector<1x16x128xbf16>,
    %c5_i32 = arith.constant 5 : i32
    %257 = arith.index_cast %c5_i32 : i32 to index
    %c0_79 = arith.constant 0 : index
    %c0_80 = arith.constant 0 : index
    %258 = vector.load %arg10[%257, %c0_79, %c0_80] : memref<8x16x384xf32, #tpu.memory_space<vmem>>, vector<1x16x384xf32>
    %259 = vector.shape_cast %258 : vector<1x16x384xf32> to vector<16x384xf32>
    %260 = arith.truncf %251 : vector<16x128xf32> to vector<16x128xbf16>
    %cst_81 = arith.constant dense<0.000000e+00> : vector<16x384xf32>
    %261 = tpu.matmul %260, %13, %cst_81 {dimension_numbers = #tpu.dot_dimension_numbers<[1], [0], [0], [1], [0, 0, 1, 1], [], []>} : vector<16x128xbf16>, vector<128x384xbf16>, vector<16x384xf32> -> vector<16x384xf32>
    %262 = vector.broadcast %14 : vector<1x384xf32> to vector<16x384xf32>
    %263 = arith.addf %261, %262 : vector<16x384xf32>
    %264 = vector.extract_strided_slice %259 {offsets = [0, 0], sizes = [16, 128], strides = [1, 1]} : vector<16x384xf32> to vector<16x128xf32>
    %265 = vector.extract_strided_slice %263 {offsets = [0, 0], sizes = [16, 128], strides = [1, 1]} : vector<16x384xf32> to vector<16x128xf32>
    %266 = arith.addf %264, %265 : vector<16x128xf32>
    %cst_82 = arith.constant 5.000000e-01 : f32
    %267 = vector.broadcast %cst_82 : f32 to vector<16x128xf32>
    %268 = arith.mulf %267, %266 : vector<16x128xf32>
    %269 = math.tanh %268 : vector<16x128xf32>
    %cst_83 = arith.constant 1.000000e+00 : f32
    %270 = vector.broadcast %cst_83 : f32 to vector<16x128xf32>
    %271 = arith.addf %269, %270 : vector<16x128xf32>
    %cst_84 = arith.constant 5.000000e-01 : f32
    %272 = vector.broadcast %cst_84 : f32 to vector<16x128xf32>
    %273 = arith.mulf %272, %271 : vector<16x128xf32>
    %274 = vector.extract_strided_slice %259 {offsets = [0, 128], sizes = [16, 128], strides = [1, 1]} : vector<16x384xf32> to vector<16x128xf32>
    %275 = vector.extract_strided_slice %263 {offsets = [0, 128], sizes = [16, 128], strides = [1, 1]} : vector<16x384xf32> to vector<16x128xf32>
    %276 = arith.addf %274, %275 : vector<16x128xf32>
    %cst_85 = arith.constant 5.000000e-01 : f32
    %277 = vector.broadcast %cst_85 : f32 to vector<16x128xf32>
    %278 = arith.mulf %277, %276 : vector<16x128xf32>
    %279 = math.tanh %278 : vector<16x128xf32>
    %cst_86 = arith.constant 1.000000e+00 : f32
    %280 = vector.broadcast %cst_86 : f32 to vector<16x128xf32>
    %281 = arith.addf %279, %280 : vector<16x128xf32>
    %cst_87 = arith.constant 5.000000e-01 : f32
    %282 = vector.broadcast %cst_87 : f32 to vector<16x128xf32>
    %283 = arith.mulf %282, %281 : vector<16x128xf32>
    %284 = vector.extract_strided_slice %259 {offsets = [0, 256], sizes = [16, 128], strides = [1, 1]} : vector<16x384xf32> to vector<16x128xf32>
    %285 = vector.extract_strided_slice %263 {offsets = [0, 256], sizes = [16, 128], strides = [1, 1]} : vector<16x384xf32> to vector<16x128xf32>
    %286 = arith.mulf %273, %285 : vector<16x128xf32>
    %287 = arith.addf %284, %286 : vector<16x128xf32>
    %288 = math.tanh %287 : vector<16x128xf32>
    %cst_88 = arith.constant 1.000000e+00 : f32
    %289 = vector.broadcast %cst_88 : f32 to vector<16x128xf32>
    %290 = arith.subf %289, %283 : vector<16x128xf32>
    %291 = arith.mulf %290, %288 : vector<16x128xf32>
    %292 = arith.mulf %283, %251 : vector<16x128xf32>
    %293 = arith.addf %291, %292 : vector<16x128xf32>
    %294 = arith.addi %15, %c5_i32 : i32
    %295 = vector.broadcast %294 : i32 to vector<16x1xi32>
    %296 = arith.cmpi slt, %295, %12 : vector<16x1xi32>
    %297 = vector.shape_cast %296 : vector<16x1xi1> to vector<16x1xi1>
    %298 = vector.broadcast %297 : vector<16x1xi1> to vector<16x128xi1>
    %299 = arith.select %298, %293, %251 : vector<16x128xi1>, vector<16x128xf32>
    %300 = arith.truncf %299 : vector<16x128xf32> to vector<16x128xbf16>
    %301 = arith.index_cast %c5_i32 : i32 to index
    %c0_89 = arith.constant 0 : index
    %c0_90 = arith.constant 0 : index
    %302 = vector.load %arg8[%301, %c0_89, %c0_90] : memref<8x16x128xbf16, #tpu.memory_space<vmem>>, vector<1x16x128xbf16>
    %303 = vector.shape_cast %302 : vector<1x16x128xbf16> to vector<16x128xbf16>
    %304 = vector.shape_cast %300 : vector<16x128xbf16> to vector<1x16x128xbf16>
    tpu.vector_store %arg8[%301, %c0_89, %c0_90], %304 {strides = array<i32>} : memref<8x16x128xbf16, #tpu.memory_space<vmem>>, vector<1x16x128xbf16>,
    %c6_i32 = arith.constant 6 : i32
    %305 = arith.index_cast %c6_i32 : i32 to index
    %c0_91 = arith.constant 0 : index
    %c0_92 = arith.constant 0 : index
    %306 = vector.load %arg10[%305, %c0_91, %c0_92] : memref<8x16x384xf32, #tpu.memory_space<vmem>>, vector<1x16x384xf32>
    %307 = vector.shape_cast %306 : vector<1x16x384xf32> to vector<16x384xf32>
    %308 = arith.truncf %299 : vector<16x128xf32> to vector<16x128xbf16>
    %cst_93 = arith.constant dense<0.000000e+00> : vector<16x384xf32>
    %309 = tpu.matmul %308, %13, %cst_93 {dimension_numbers = #tpu.dot_dimension_numbers<[1], [0], [0], [1], [0, 0, 1, 1], [], []>} : vector<16x128xbf16>, vector<128x384xbf16>, vector<16x384xf32> -> vector<16x384xf32>
    %310 = vector.broadcast %14 : vector<1x384xf32> to vector<16x384xf32>
    %311 = arith.addf %309, %310 : vector<16x384xf32>
    %312 = vector.extract_strided_slice %307 {offsets = [0, 0], sizes = [16, 128], strides = [1, 1]} : vector<16x384xf32> to vector<16x128xf32>
    %313 = vector.extract_strided_slice %311 {offsets = [0, 0], sizes = [16, 128], strides = [1, 1]} : vector<16x384xf32> to vector<16x128xf32>
    %314 = arith.addf %312, %313 : vector<16x128xf32>
    %cst_94 = arith.constant 5.000000e-01 : f32
    %315 = vector.broadcast %cst_94 : f32 to vector<16x128xf32>
    %316 = arith.mulf %315, %314 : vector<16x128xf32>
    %317 = math.tanh %316 : vector<16x128xf32>
    %cst_95 = arith.constant 1.000000e+00 : f32
    %318 = vector.broadcast %cst_95 : f32 to vector<16x128xf32>
    %319 = arith.addf %317, %318 : vector<16x128xf32>
    %cst_96 = arith.constant 5.000000e-01 : f32
    %320 = vector.broadcast %cst_96 : f32 to vector<16x128xf32>
    %321 = arith.mulf %320, %319 : vector<16x128xf32>
    %322 = vector.extract_strided_slice %307 {offsets = [0, 128], sizes = [16, 128], strides = [1, 1]} : vector<16x384xf32> to vector<16x128xf32>
    %323 = vector.extract_strided_slice %311 {offsets = [0, 128], sizes = [16, 128], strides = [1, 1]} : vector<16x384xf32> to vector<16x128xf32>
    %324 = arith.addf %322, %323 : vector<16x128xf32>
    %cst_97 = arith.constant 5.000000e-01 : f32
    %325 = vector.broadcast %cst_97 : f32 to vector<16x128xf32>
    %326 = arith.mulf %325, %324 : vector<16x128xf32>
    %327 = math.tanh %326 : vector<16x128xf32>
    %cst_98 = arith.constant 1.000000e+00 : f32
    %328 = vector.broadcast %cst_98 : f32 to vector<16x128xf32>
    %329 = arith.addf %327, %328 : vector<16x128xf32>
    %cst_99 = arith.constant 5.000000e-01 : f32
    %330 = vector.broadcast %cst_99 : f32 to vector<16x128xf32>
    %331 = arith.mulf %330, %329 : vector<16x128xf32>
    %332 = vector.extract_strided_slice %307 {offsets = [0, 256], sizes = [16, 128], strides = [1, 1]} : vector<16x384xf32> to vector<16x128xf32>
    %333 = vector.extract_strided_slice %311 {offsets = [0, 256], sizes = [16, 128], strides = [1, 1]} : vector<16x384xf32> to vector<16x128xf32>
    %334 = arith.mulf %321, %333 : vector<16x128xf32>
    %335 = arith.addf %332, %334 : vector<16x128xf32>
    %336 = math.tanh %335 : vector<16x128xf32>
    %cst_100 = arith.constant 1.000000e+00 : f32
    %337 = vector.broadcast %cst_100 : f32 to vector<16x128xf32>
    %338 = arith.subf %337, %331 : vector<16x128xf32>
    %339 = arith.mulf %338, %336 : vector<16x128xf32>
    %340 = arith.mulf %331, %299 : vector<16x128xf32>
    %341 = arith.addf %339, %340 : vector<16x128xf32>
    %342 = arith.addi %15, %c6_i32 : i32
    %343 = vector.broadcast %342 : i32 to vector<16x1xi32>
    %344 = arith.cmpi slt, %343, %12 : vector<16x1xi32>
    %345 = vector.shape_cast %344 : vector<16x1xi1> to vector<16x1xi1>
    %346 = vector.broadcast %345 : vector<16x1xi1> to vector<16x128xi1>
    %347 = arith.select %346, %341, %299 : vector<16x128xi1>, vector<16x128xf32>
    %348 = arith.truncf %347 : vector<16x128xf32> to vector<16x128xbf16>
    %349 = arith.index_cast %c6_i32 : i32 to index
    %c0_101 = arith.constant 0 : index
    %c0_102 = arith.constant 0 : index
    %350 = vector.load %arg8[%349, %c0_101, %c0_102] : memref<8x16x128xbf16, #tpu.memory_space<vmem>>, vector<1x16x128xbf16>
    %351 = vector.shape_cast %350 : vector<1x16x128xbf16> to vector<16x128xbf16>
    %352 = vector.shape_cast %348 : vector<16x128xbf16> to vector<1x16x128xbf16>
    tpu.vector_store %arg8[%349, %c0_101, %c0_102], %352 {strides = array<i32>} : memref<8x16x128xbf16, #tpu.memory_space<vmem>>, vector<1x16x128xbf16>,
    %c7_i32 = arith.constant 7 : i32
    %353 = arith.index_cast %c7_i32 : i32 to index
    %c0_103 = arith.constant 0 : index
    %c0_104 = arith.constant 0 : index
    %354 = vector.load %arg10[%353, %c0_103, %c0_104] : memref<8x16x384xf32, #tpu.memory_space<vmem>>, vector<1x16x384xf32>
    %355 = vector.shape_cast %354 : vector<1x16x384xf32> to vector<16x384xf32>
    %356 = arith.truncf %347 : vector<16x128xf32> to vector<16x128xbf16>
    %cst_105 = arith.constant dense<0.000000e+00> : vector<16x384xf32>
    %357 = tpu.matmul %356, %13, %cst_105 {dimension_numbers = #tpu.dot_dimension_numbers<[1], [0], [0], [1], [0, 0, 1, 1], [], []>} : vector<16x128xbf16>, vector<128x384xbf16>, vector<16x384xf32> -> vector<16x384xf32>
    %358 = vector.broadcast %14 : vector<1x384xf32> to vector<16x384xf32>
    %359 = arith.addf %357, %358 : vector<16x384xf32>
    %360 = vector.extract_strided_slice %355 {offsets = [0, 0], sizes = [16, 128], strides = [1, 1]} : vector<16x384xf32> to vector<16x128xf32>
    %361 = vector.extract_strided_slice %359 {offsets = [0, 0], sizes = [16, 128], strides = [1, 1]} : vector<16x384xf32> to vector<16x128xf32>
    %362 = arith.addf %360, %361 : vector<16x128xf32>
    %cst_106 = arith.constant 5.000000e-01 : f32
    %363 = vector.broadcast %cst_106 : f32 to vector<16x128xf32>
    %364 = arith.mulf %363, %362 : vector<16x128xf32>
    %365 = math.tanh %364 : vector<16x128xf32>
    %cst_107 = arith.constant 1.000000e+00 : f32
    %366 = vector.broadcast %cst_107 : f32 to vector<16x128xf32>
    %367 = arith.addf %365, %366 : vector<16x128xf32>
    %cst_108 = arith.constant 5.000000e-01 : f32
    %368 = vector.broadcast %cst_108 : f32 to vector<16x128xf32>
    %369 = arith.mulf %368, %367 : vector<16x128xf32>
    %370 = vector.extract_strided_slice %355 {offsets = [0, 128], sizes = [16, 128], strides = [1, 1]} : vector<16x384xf32> to vector<16x128xf32>
    %371 = vector.extract_strided_slice %359 {offsets = [0, 128], sizes = [16, 128], strides = [1, 1]} : vector<16x384xf32> to vector<16x128xf32>
    %372 = arith.addf %370, %371 : vector<16x128xf32>
    %cst_109 = arith.constant 5.000000e-01 : f32
    %373 = vector.broadcast %cst_109 : f32 to vector<16x128xf32>
    %374 = arith.mulf %373, %372 : vector<16x128xf32>
    %375 = math.tanh %374 : vector<16x128xf32>
    %cst_110 = arith.constant 1.000000e+00 : f32
    %376 = vector.broadcast %cst_110 : f32 to vector<16x128xf32>
    %377 = arith.addf %375, %376 : vector<16x128xf32>
    %cst_111 = arith.constant 5.000000e-01 : f32
    %378 = vector.broadcast %cst_111 : f32 to vector<16x128xf32>
    %379 = arith.mulf %378, %377 : vector<16x128xf32>
    %380 = vector.extract_strided_slice %355 {offsets = [0, 256], sizes = [16, 128], strides = [1, 1]} : vector<16x384xf32> to vector<16x128xf32>
    %381 = vector.extract_strided_slice %359 {offsets = [0, 256], sizes = [16, 128], strides = [1, 1]} : vector<16x384xf32> to vector<16x128xf32>
    %382 = arith.mulf %369, %381 : vector<16x128xf32>
    %383 = arith.addf %380, %382 : vector<16x128xf32>
    %384 = math.tanh %383 : vector<16x128xf32>
    %cst_112 = arith.constant 1.000000e+00 : f32
    %385 = vector.broadcast %cst_112 : f32 to vector<16x128xf32>
    %386 = arith.subf %385, %379 : vector<16x128xf32>
    %387 = arith.mulf %386, %384 : vector<16x128xf32>
    %388 = arith.mulf %379, %347 : vector<16x128xf32>
    %389 = arith.addf %387, %388 : vector<16x128xf32>
    %390 = arith.addi %15, %c7_i32 : i32
    %391 = vector.broadcast %390 : i32 to vector<16x1xi32>
    %392 = arith.cmpi slt, %391, %12 : vector<16x1xi32>
    %393 = vector.shape_cast %392 : vector<16x1xi1> to vector<16x1xi1>
    %394 = vector.broadcast %393 : vector<16x1xi1> to vector<16x128xi1>
    %395 = arith.select %394, %389, %347 : vector<16x128xi1>, vector<16x128xf32>
    %396 = arith.truncf %395 : vector<16x128xf32> to vector<16x128xbf16>
    %397 = arith.index_cast %c7_i32 : i32 to index
    %c0_113 = arith.constant 0 : index
    %c0_114 = arith.constant 0 : index
    %398 = vector.load %arg8[%397, %c0_113, %c0_114] : memref<8x16x128xbf16, #tpu.memory_space<vmem>>, vector<1x16x128xbf16>
    %399 = vector.shape_cast %398 : vector<1x16x128xbf16> to vector<16x128xbf16>
    %400 = vector.shape_cast %396 : vector<16x128xbf16> to vector<1x16x128xbf16>
    tpu.vector_store %arg8[%397, %c0_113, %c0_114], %400 {strides = array<i32>} : memref<8x16x128xbf16, #tpu.memory_space<vmem>>, vector<1x16x128xbf16>,
    %c8_i32_115 = arith.constant 8 : i32
    %c0_116 = arith.constant 0 : index
    %c0_117 = arith.constant 0 : index
    %401 = vector.load %arg11[%c0_116, %c0_117] : memref<16x128xf32, #tpu.memory_space<vmem>>, vector<16x128xf32>
    tpu.vector_store %arg11[%c0_116, %c0_117], %395 {strides = array<i32>} : memref<16x128xf32, #tpu.memory_space<vmem>>, vector<16x128xf32>,
    %c0_i32_118 = arith.constant 0 : i32
    %402 = arith.cmpi eq, %arg1, %c0_i32_118 : i32
    %403 = arith.extui %402 : i1 to i32
    %c0_i32_119 = arith.constant 0 : i32
    %404 = arith.cmpi ne, %403, %c0_i32_119 : i32
    scf.if %404 {
      %c0_120 = arith.constant 0 : index
      %c0_121 = arith.constant 0 : index
      %405 = vector.load %arg9[%c0_120, %c0_121] : memref<16x128xf32, #tpu.memory_space<vmem>>, vector<16x128xf32>
      tpu.vector_store %arg9[%c0_120, %c0_121], %395 {strides = array<i32>} : memref<16x128xf32, #tpu.memory_space<vmem>>, vector<16x128xf32>,
    } else {
    }
    return
  }
  func.func @transform_0(%arg0: i32, %arg1: i32) -> (i32, i32, i32) {
    %c0_i32 = arith.constant 0 : i32
    %c0_i32_0 = arith.constant 0 : i32
    return %arg1, %arg0, %c0_i32 : i32, i32, i32
  }
  func.func @transform_1(%arg0: i32, %arg1: i32) -> (i32, i32) {
    %c0_i32 = arith.constant 0 : i32
    %c0_i32_0 = arith.constant 0 : i32
    return %arg0, %c0_i32 : i32, i32
  }
  func.func @transform_2(%arg0: i32, %arg1: i32) -> (i32, i32) {
    %c0_i32 = arith.constant 0 : i32
    %c0_i32_0 = arith.constant 0 : i32
    %c0_i32_1 = arith.constant 0 : i32
    return %c0_i32, %c0_i32_0 : i32, i32
  }
  func.func @transform_3(%arg0: i32, %arg1: i32) -> (i32, i32) {
    %c0_i32 = arith.constant 0 : i32
    %c0_i32_0 = arith.constant 0 : i32
    %c0_i32_1 = arith.constant 0 : i32
    return %c0_i32, %c0_i32_0 : i32, i32
  }
  func.func @transform_4(%arg0: i32, %arg1: i32) -> (i32, i32) {
    %c0_i32 = arith.constant 0 : i32
    %c0_i32_0 = arith.constant 0 : i32
    %c0_i32_1 = arith.constant 0 : i32
    return %c0_i32, %c0_i32_0 : i32, i32
  }
  func.func @transform_5(%arg0: i32, %arg1: i32) -> (i32, i32) {
    %c0_i32 = arith.constant 0 : i32
    %c0_i32_0 = arith.constant 0 : i32
    %c0_i32_1 = arith.constant 0 : i32
    return %c0_i32, %c0_i32_0 : i32, i32
  }
  func.func @transform_6(%arg0: i32, %arg1: i32) -> (i32, i32, i32) {
    %c0_i32 = arith.constant 0 : i32
    %c0_i32_0 = arith.constant 0 : i32
    return %arg1, %arg0, %c0_i32 : i32, i32, i32
  }
  func.func @transform_7(%arg0: i32, %arg1: i32) -> (i32, i32) {
    %c0_i32 = arith.constant 0 : i32
    %c0_i32_0 = arith.constant 0 : i32
    return %arg0, %c0_i32 : i32, i32
  }
}

</mosaic_0001>

<bundles_post_ra>
// kernel: tpu_custom_call.1
= control target key start
LH: loop header
LB: loop body
LE: loop exit
PB: predicated region body
PF: predicated region fallthrough
CT: control target
= control target key end

     0   :  { %13 = vsyncpa [#allocation5], 0  ;;  %s2860_s0 = inlined_call_operand.hbm [shape: bf16[8,16,128], index: 0, kind: input, shape index: {}]   ;;  %s2861_s1 = inlined_call_operand.vmem [shape: s32[16,1], index: 1, kind: input, shape index: {}]   ;;  %s2862_s2 = inlined_call_operand.hbm [shape: bf16[128,384], index: 2, kind: input, shape index: {}]   ;;  %s2863_s3 = inlined_call_operand.vmem [shape: f32[1,384], index: 3, kind: input, shape index: {}]   ;;  %s2864_s4 = inlined_call_operand.hbm [shape: bf16[128,384], index: 4, kind: input, shape index: {}]   ;;  %s2865_s5 = inlined_call_operand.vmem [shape: f32[1,384], index: 5, kind: input, shape index: {}]   ;;  %s2866_s6 = inlined_call_operand.hbm [shape: bf16[8,16,128], index: 6, kind: output, shape index: {0}]   ;;  %s2867_s7 = inlined_call_operand.hbm [shape: f32[16,128], index: 7, kind: output, shape index: {1}]  }
   0x1   :  { %14 = vsyncpa [#allocation8], 0 }
   0x2   :  { %15 = vsyncpa [#allocation6], 0  ;;  %s36_s26 = sshll.u32 %s2862_s2, 4  ;;  %s37_s26 = int_to_ptr.hbm [resolvable:$true] %s36_s26 }
   0x3   :  { %16 = vsyncpa [#allocation12], 0  ;;  %s2173_s27 = smov [#allocation7]   ;;  %s21_s8 = sshll.u32 %s2860_s0, 4  ;;  %s22_s8 = int_to_ptr.hbm [resolvable:$true] %s21_s8 }
   0x4   :  { %s38_s28 = sshll.u32 %s2173_s27, 4  ;;  %s2174_s9 = smov 192   ;;  %s39_s28 = int_to_ptr.vmem [resolvable:$true] %s38_s28 }
   0x5   :  { %s2175_s10 = smov 12   ;;  %s2176_s11 = smov [#allocation4]  }
   0x6   :  { %44 = dma.hbm_to_vmem [thread:$0]  %s37_s26, 3072, %s39_s28, [#allocation8], %s2174_s9, %s2174_s9, %s2175_s10  }
   0x7   :  { %s23_s12 = sshll.u32 %s2176_s11, 4  ;;  %s2177_s13 = smov 64   ;;  %s24_s12 = int_to_ptr.vmem [resolvable:$true] %s23_s12 }
   0x8   :  { %s2178_s14 = smov 4   ;;  %s51_s16 = sshll.u32 %s2864_s4, 4  ;;  %s52_s16 = int_to_ptr.hbm [resolvable:$true] %s51_s16 }
   0x9   :  { %29 = dma.hbm_to_vmem [thread:$0]  %s22_s8, 1024, %s24_s12, [#allocation5], %s2177_s13, %s2177_s13, %s2178_s14  }
   0xa   :  { %s2179_s17 = smov [#allocation9]  }
   0xb   :  { %s53_s0 = sshll.u32 %s2179_s17, 4  ;;  %s54_s0 = int_to_ptr.vmem [resolvable:$true] %s53_s0 }
   0xc   :  { %59 = dma.hbm_to_vmem [thread:$0]  %s52_s16, 3072, %s54_s0, [#allocation8], %s2174_s9, %s2174_s9, %s2175_s10  }
   0xd   :  { %2165 = dma.done.wait [#allocation5], 1024  }
   0xe   :  { %2166 = vsyncadd [#allocation5], 4294966272 }
   0xf   :  { %2167 = dma.done.wait [#allocation8], 6144  }
  0x10   :  { %2168 = vsyncadd [#allocation8], 4294961152  ;;  %v1811_v0 = vld [vmem:[#allocation9 + $0xa8] sm:$0xf]  ;;  %v1891_v1 = vld [vmem:[#allocation9 + $0xb0] sm:$0xf0] }
  0x11   :  { %v1799_v2 = vld [vmem:[#allocation9 + $0x90] sm:$0xf]  ;;  %v2238_v3 = vor.u32 %v1891_v1, %v1811_v0  ;;  %v1888_v4 = vld [vmem:[#allocation9 + $0x98] sm:$0xf0]  ;;  %v1787_v6 = vld [vmem:[#allocation9 + $0x78] sm:$0xf] }
  0x12   :  { %v2241_v5 = vor.u32 %v1888_v4, %v1799_v2  ;;  %v1885_v7 = vld [vmem:[#allocation9 + $0x80] sm:$0xf0]  ;;  %v1715_v8 = vld [vmem:[#allocation7 + $0xa8] sm:$0xf]  ;;  %v1867_v9 = vld [vmem:[#allocation7 + $0xb0] sm:$0xf0] }
  0x13   :  { %687 = vmatpush.bf16.msra.mxu3 %v2238_v3  ;;  %v1716_v10 = vor.u32 %v1867_v9, %v1715_v8  ;;  %v1703_v11 = vld [vmem:[#allocation7 + $0x90] sm:$0xf]  ;;  %v1864_v12 = vld [vmem:[#allocation7 + $0x98] sm:$0xf0]  ;;  %v2244_v13 = vor.u32 %v1885_v7, %v1787_v6  ;;  %v1775_v14 = vld [vmem:[#allocation9 + $0x60] sm:$0xf] }
  0x14   :  { %v1704_v15 = vor.u32 %v1864_v12, %v1703_v11  ;;  %v1882_v16 = vld [vmem:[#allocation9 + $0x68] sm:$0xf0]  ;;  %v1691_v17 = vld [vmem:[#allocation7 + $0x78] sm:$0xf]  ;;  %v1861_v18 = vld [vmem:[#allocation7 + $0x80] sm:$0xf0] }
  0x15   :  { %312 = vmatpush.bf16.msra.mxu0 %v1716_v10  ;;  %v1866_v19 = vld [vmem:[#allocation7 + $0xac] sm:$0xf]  ;;  %v2247_v20 = vor.u32 %v1882_v16, %v1775_v14  ;;  %v1763_v21 = vld [vmem:[#allocation9 + $0x48] sm:$0xf]  ;;  %v1879_v22 = vld [vmem:[#allocation9 + $0x50] sm:$0xf0]  ;;  %v1692_v23 = vor.u32 %v1861_v18, %v1691_v17 }
  0x16   :  { %v1717_v24 = vld [vmem:[#allocation7 + $0xb4] sm:$0xf0]  ;;  %v1679_v25 = vld [vmem:[#allocation7 + $0x60] sm:$0xf]  ;;  %v1858_v26 = vld [vmem:[#allocation7 + $0x68] sm:$0xf0]  ;;  %v2250_v31 = vor.u32 %v1879_v22, %v1763_v21 }
  0x17   :  { %688 = vmatpush.bf16.msra.mxu3 %v2241_v5  ;;  %v1720_v27 = vor.u32 %v1866_v19, %v1717_v24  ;;  %v1863_v28 = vld [vmem:[#allocation7 + $0x94] sm:$0xf]  ;;  %v1705_v29 = vld [vmem:[#allocation7 + $0x9c] sm:$0xf0]  ;;  %v1751_v32 = vld [vmem:[#allocation9 + $0x30] sm:$0xf]  ;;  %v1680_v34 = vor.u32 %v1858_v26, %v1679_v25 }
  0x18   :  { %v1708_v30 = vor.u32 %v1863_v28, %v1705_v29  ;;  %v1876_v33 = vld [vmem:[#allocation9 + $0x38] sm:$0xf0]  ;;  %v1667_v35 = vld [vmem:[#allocation7 + $0x48] sm:$0xf]  ;;  %v1855_v36 = vld [vmem:[#allocation7 + $0x50] sm:$0xf0] }
  0x19   :  { %313 = vmatpush.bf16.msra.mxu0 %v1704_v15  ;;  %361 = vmatpush.bf16.msra.mxu1 %v1720_v27  ;;  %v1860_v37 = vld [vmem:[#allocation7 + $0x7c] sm:$0xf]  ;;  %v1693_v38 = vld [vmem:[#allocation7 + $0x84] sm:$0xf0]  ;;  %v2253_v40 = vor.u32 %v1876_v33, %v1751_v32  ;;  %v1739_v41 = vld [vmem:[#allocation9 + $0x18] sm:$0xf]  ;;  %v1668_v43 = vor.u32 %v1855_v36, %v1667_v35 }
  0x1a   :  { %v1696_v39 = vor.u32 %v1860_v37, %v1693_v38  ;;  %v1873_v42 = vld [vmem:[#allocation9 + $0x20] sm:$0xf0]  ;;  %v1655_v44 = vld [vmem:[#allocation7 + $0x30] sm:$0xf]  ;;  %v1852_v45 = vld [vmem:[#allocation7 + $0x38] sm:$0xf0] }
  0x1b   :  { %689 = vmatpush.bf16.msra.mxu3 %v2244_v13  ;;  %v1857_v46 = vld [vmem:[#allocation7 + $0x64] sm:$0xf]  ;;  %v1681_v47 = vld [vmem:[#allocation7 + $0x6c] sm:$0xf0]  ;;  %v1868_v49 = vld [vmem:[#allocation7 + $0xb8] sm:$0xf0]  ;;  %v2256_v53 = vor.u32 %v1873_v42, %v1739_v41  ;;  %v1656_v56 = vor.u32 %v1852_v45, %v1655_v44 }
  0x1c   :  { %v1723_v48 = vld [vmem:[#allocation7 + $0xb0] sm:$0xf]  ;;  %v1727_v50 = vld [vmem:[#allocation9] sm:$0xf]  ;;  %v1684_v51 = vor.u32 %v1857_v46, %v1681_v47  ;;  %v1870_v54 = vld [vmem:[#allocation9 + $0x8] sm:$0xf0] }
  0x1d   :  { %314 = vmatpush.bf16.msra.mxu0 %v1692_v23  ;;  %362 = vmatpush.bf16.msra.mxu1 %v1708_v30  ;;  %v1724_v52 = vor.u32 %v1868_v49, %v1723_v48  ;;  %v1890_v55 = vld [vmem:[#allocation9 + $0xac] sm:$0xf]  ;;  %v1643_v57 = vld [vmem:[#allocation7 + $0x18] sm:$0xf]  ;;  %v1849_v58 = vld [vmem:[#allocation7 + $0x20] sm:$0xf0]  ;;  %v2259_v2 = vor.u32 %v1870_v54, %v1727_v50 }
  0x1e   :  { %v1854_v59 = vld [vmem:[#allocation7 + $0x4c] sm:$0xf]  ;;  %v1669_v60 = vld [vmem:[#allocation7 + $0x54] sm:$0xf0]  ;;  %v1865_v63 = vld [vmem:[#allocation7 + $0xa0] sm:$0xf0]  ;;  %v1644_v4 = vor.u32 %v1849_v58, %v1643_v57 }
  0x1f   :  { %690 = vmatpush.bf16.msra.mxu3 %v2247_v20  ;;  %410 = vmatpush.bf16.msra.mxu2 %v1724_v52  ;;  %v1813_v61 = vld [vmem:[#allocation9 + $0xb4] sm:$0xf0]  ;;  %v1672_v0 = vor.u32 %v1854_v59, %v1669_v60  ;;  %v1631_v6 = vld [vmem:[#allocation7] sm:$0xf]  ;;  %v1846_v7 = vld [vmem:[#allocation7 + $0x8] sm:$0xf0] }
  0x20   :  { %v1711_v62 = vld [vmem:[#allocation7 + $0x98] sm:$0xf]  ;;  %v2261_v8 = vor.u32 %v1890_v55, %v1813_v61  ;;  %v1851_v9 = vld [vmem:[#allocation7 + $0x34] sm:$0xf]  ;;  %v1657_v10 = vld [vmem:[#allocation7 + $0x3c] sm:$0xf0]  ;;  %v1632_v18 = vor.u32 %v1846_v7, %v1631_v6 }
  0x21   :  { %315 = vmatpush.bf16.msra.mxu0 %v1680_v34  ;;  %363 = vmatpush.bf16.msra.mxu1 %v1696_v39  ;;  %v1712_v1 = vor.u32 %v1865_v63, %v1711_v62  ;;  %v1699_v11 = vld [vmem:[#allocation7 + $0x80] sm:$0xf]  ;;  %v1887_v12 = vld [vmem:[#allocation9 + $0x94] sm:$0xf]  ;;  %v1862_v15 = vld [vmem:[#allocation7 + $0x88] sm:$0xf0]  ;;  %v1660_v16 = vor.u32 %v1851_v9, %v1657_v10 }
  0x22   :  { %v1801_v14 = vld [vmem:[#allocation9 + $0x9c] sm:$0xf0]  ;;  %v1700_v17 = vor.u32 %v1862_v15, %v1699_v11  ;;  %v1848_v21 = vld [vmem:[#allocation7 + $0x1c] sm:$0xf]  ;;  %v1645_v22 = vld [vmem:[#allocation7 + $0x24] sm:$0xf0] }
  0x23   :  { %691 = vmatpush.bf16.msra.mxu3 %v2250_v31  ;;  %411 = vmatpush.bf16.msra.mxu2 %v1712_v1  ;;  %v2265_v19 = vor.u32 %v1887_v12, %v1801_v14  ;;  %v1687_v23 = vld [vmem:[#allocation7 + $0x68] sm:$0xf]  ;;  %v1884_v24 = vld [vmem:[#allocation9 + $0x7c] sm:$0xf]  ;;  %v1859_v26 = vld [vmem:[#allocation7 + $0x70] sm:$0xf0]  ;;  %v1648_v29 = vor.u32 %v1848_v21, %v1645_v22 }
  0x24   :  { %v1789_v25 = vld [vmem:[#allocation9 + $0x84] sm:$0xf0]  ;;  %v2180_v27 = vmov 0.0|0.0   ;;  %v2268_v28 = vld [vmem:[#allocation4] sm:$0xff]  ;;  %v1688_v30 = vor.u32 %v1859_v26, %v1687_v23  ;;  %v1633_v34 = vld [vmem:[#allocation7 + $0xc] sm:$0xf0] }
  0x25   :  { %316 = vmatpush.bf16.msra.mxu0 %v1668_v43  ;;  %364 = vmatpush.bf16.msra.mxu1 %v1684_v51  ;;  %v2271_v32 = vor.u32 %v1884_v24, %v1789_v25  ;;  %v1845_v33 = vld [vmem:[#allocation7 + $0x4] sm:$0xf]  ;;  %v1675_v35 = vld [vmem:[#allocation7 + $0x50] sm:$0xf]  ;;  %v1856_v38 = vld [vmem:[#allocation7 + $0x58] sm:$0xf0] }
  0x26   :  { %v1881_v36 = vld [vmem:[#allocation9 + $0x64] sm:$0xf]  ;;  %v1777_v37 = vld [vmem:[#allocation9 + $0x6c] sm:$0xf0]  ;;  %v1892_v41 = vld [vmem:[#allocation9 + $0xb8] sm:$0xf0]  ;;  %v1636_v42 = vor.u32 %v1845_v33, %v1633_v34  ;;  %v1676_v43 = vor.u32 %v1856_v38, %v1675_v35 }
  0x27   :  { %692 = vmatpush.bf16.msra.mxu3 %v2253_v40  ;;  %412 = vmatpush.bf16.msra.mxu2 %v1700_v17  ;;  %v1819_v39 = vld [vmem:[#allocation9 + $0xb0] sm:$0xf]  ;;  %v2276_v44 = vor.u32 %v1881_v36, %v1777_v37  ;;  %v1663_v45 = vld [vmem:[#allocation7 + $0x38] sm:$0xf]  ;;  %v1853_v46 = vld [vmem:[#allocation7 + $0x40] sm:$0xf0] }
  0x28   :  { %v1878_v47 = vld [vmem:[#allocation9 + $0x4c] sm:$0xf]  ;;  %v1765_v48 = vld [vmem:[#allocation9 + $0x54] sm:$0xf0]  ;;  %v2278_v49 = vor.u32 %v1892_v41, %v1819_v39  ;;  %v1664_v50 = vor.u32 %v1853_v46, %v1663_v45  ;;  %v1889_v52 = vld [vmem:[#allocation9 + $0xa0] sm:$0xf0] }
  0x29   :  { %317 = vmatpush.bf16.msra.mxu0 %v1656_v56  ;;  %365 = vmatpush.bf16.msra.mxu1 %v1672_v0  ;;  %v1807_v51 = vld [vmem:[#allocation9 + $0x98] sm:$0xf]  ;;  %v2283_v54 = vor.u32 %v1878_v47, %v1765_v48  ;;  %v1651_v55 = vld [vmem:[#allocation7 + $0x20] sm:$0xf]  ;;  %v1850_v56 = vld [vmem:[#allocation7 + $0x28] sm:$0xf0] }
  0x2a   :  { %v1875_v57 = vld [vmem:[#allocation9 + $0x34] sm:$0xf]  ;;  %v1753_v58 = vld [vmem:[#allocation9 + $0x3c] sm:$0xf0]  ;;  %v2285_v59 = vor.u32 %v1889_v52, %v1807_v51  ;;  %v1652_v60 = vor.u32 %v1850_v56, %v1651_v55  ;;  %v1886_v62 = vld [vmem:[#allocation9 + $0x88] sm:$0xf0] }
  0x2b   :  { %693 = vmatpush.bf16.msra.mxu3 %v2256_v53  ;;  %413 = vmatpush.bf16.msra.mxu2 %v1688_v30  ;;  %v1795_v61 = vld [vmem:[#allocation9 + $0x80] sm:$0xf]  ;;  %v2291_v63 = vor.u32 %v1875_v57, %v1753_v58  ;;  %v1639_v0 = vld [vmem:[#allocation7 + $0x8] sm:$0xf]  ;;  %v1847_v1 = vld [vmem:[#allocation7 + $0x10] sm:$0xf0] }
  0x2c   :  { %v1741_v6 = vld [vmem:[#allocation9 + $0x24] sm:$0xf0]  ;;  %v2293_v7 = vor.u32 %v1886_v62, %v1795_v61  ;;  %v1640_v9 = vor.u32 %v1847_v1, %v1639_v0  ;;  %v1883_v11 = vld [vmem:[#allocation9 + $0x70] sm:$0xf0]  ;;  %v2868_v12 = vmov 0   ;;  %v2300_v14 = vld [vmem:[%s2861_s1] sm:$0xff] }
  0x2d   :  { %318 = vmatpush.bf16.msra.mxu0 %v1644_v4  ;;  %366 = vmatpush.bf16.msra.mxu1 %v1660_v16  ;;  %v1872_v4 = vld [vmem:[#allocation9 + $0x1c] sm:$0xf]  ;;  %v1783_v10 = vld [vmem:[#allocation9 + $0x68] sm:$0xf]  ;;  %vm1821_vm0 = vcmp.gt.s32.totalorder %v2300_v14, 0  ;;  %vm1827_vm2 = vcmp.gt.s32.totalorder %v2300_v14, 3 }
  0x2e   :  { %1946 = vset.pattern.permute.xlu0 %v2868_v12  ;;  %1947 = vset.pattern.permute.xlu1 %v2868_v12  ;;  %v2307_v15 = vor.u32 %v1872_v4, %v1741_v6  ;;  %v766_v16 = vsel %vm1821_vm0, 1, %v2868_v12  ;;  %v1869_v17 = vld [vmem:[#allocation9 + $0x4] sm:$0xf]  ;;  %v2310_v21 = vor.u32 %v1883_v11, %v1783_v10  ;;  %v1771_v22 = vld [vmem:[#allocation9 + $0x50] sm:$0xf]  ;;  %v2325_v26 = vld [vmem:[%s2861_s1 + $0x8] sm:$0xff] }
  0x2f   :  { %694 = vmatpush.bf16.msra.mxu3 %v2259_v2  ;;  %414 = vmatpush.bf16.msra.mxu2 %v1676_v43  ;;  %v1880_v23 = vld [vmem:[#allocation9 + $0x58] sm:$0xf0]  ;;  %vm1822_vm1 = vcmp.gt.s32.totalorder %v2325_v26, 0  ;;  %v1838_v33 = vld [vmem:[#allocation4 + $0x8] sm:$0xff]  ;;  %v1747_v35 = vld [vmem:[#allocation9 + $0x20] sm:$0xf] }
  0x30   :  { %1948 = vset.pattern.permute.xlu2 %v2868_v12  ;;  %769 = vperm.xlu0 %1946, %v766_v16   ;;  %v2319_v25 = vor.u32 %v1880_v23, %v1771_v22  ;;  %v767_v30 = vsel %vm1822_vm1, 1, %v2868_v12  ;;  %v1874_v36 = vld [vmem:[#allocation9 + $0x28] sm:$0xf0]  ;;  %v1095_v37 = vsel %vm1827_vm2, 1, %v2868_v12  ;;  %v1735_v39 = vld [vmem:[#allocation9 + $0x8] sm:$0xf] }
  0x31   :  { %319 = vmatpush.bf16.msra.mxu0 %v1632_v18  ;;  %367 = vmatpush.bf16.msra.mxu1 %v1648_v29  ;;  %v1729_v18 = vld [vmem:[#allocation9 + $0xc] sm:$0xf0]  ;;  %v1877_v29 = vld [vmem:[#allocation9 + $0x40] sm:$0xf0]  ;;  %v2345_v38 = vor.u32 %v1874_v36, %v1747_v35  ;;  %v1871_v41 = vld [vmem:[#allocation9 + $0x10] sm:$0xf0] }
  0x32   :  { %695 = vmatmul.bf16.vlgmr.msra.gmra.mxu3 %v2180_v27  ;;  %v2317_v24 = vor.u32 %v1869_v17, %v1729_v18  ;;  %vm1830_vm3 = vcmp.gt.s32.totalorder %v2325_v26, 4  ;;  %v1839_v45 = vld [vmem:[#allocation4 + $0x10] sm:$0xff]  ;;  %vm1833_vm4 = vcmp.gt.s32.totalorder %v2300_v14, 6  ;;  %vm1836_vm5 = vcmp.gt.s32.totalorder %v2325_v26, 7  ;;  %v1840_v48 = vld [vmem:[#allocation4 + $0x18] sm:$0xff]  ;;  %s1578_s26 = sshll.u32 %s2867_s7, 4  ;;  %s1579_s26 = int_to_ptr.hbm [resolvable:$true] %s1578_s26 }
  0x33   :  { %701 = vmatpush.bf16.msrb.mxu3 %v2261_v8  ;;  %415 = vmatpush.bf16.msra.mxu2 %v1664_v50  ;;  %v1206_v43 = vsel %vm1830_vm3, 1, %v2868_v12  ;;  %v1425_v46 = vsel %vm1833_vm4, 1, %v2868_v12  ;;  %v1536_v47 = vsel %vm1836_vm5, 1, %v2868_v12  ;;  %v1842_v50 = vld [vmem:[#allocation4 + $0x28] sm:$0xff]  ;;  %v1843_v52 = vld [vmem:[#allocation4 + $0x30] sm:$0xff]  ;;  %v1844_v18 = vld [vmem:[#allocation4 + $0x38] sm:$0xff] }
  0x34   :  { %320 = vmatmul.bf16.vlgmr.msra.gmra.mxu0 %v2268_v28  ;;  %v128_v56 = vld [vmem:[%s2863_s3] sm:$0x7]  ;;  %vm1823_vm6 = vcmp.gt.s32.totalorder %v2300_v14, 1  ;;  %vm1824_vm7 = vcmp.gt.s32.totalorder %v2325_v26, 1  ;;  %vm1828_vm8 = vcmp.gt.s32.totalorder %v2325_v26, 3  ;;  %vm1831_vm10 = vcmp.gt.s32.totalorder %v2300_v14, 5 }
  0x35   :  { %809 = vmatpush.bf16.msrb.mxu0 %v2261_v8  ;;  %368 = vmatpush.bf16.msra.mxu1 %v1636_v42  ;;  %v2352_v42 = vor.u32 %v1871_v41, %v1735_v39  ;;  %v541_v57 = vld [vmem:[%s2865_s5] sm:$0x7]  ;;  %vm1834_vm12 = vcmp.gt.s32.totalorder %v2325_v26, 6  ;;  %vm1825_vm13 = vcmp.gt.s32.totalorder %v2300_v14, 2  ;;  %vm1826_vm14 = vcmp.gt.s32.totalorder %v2325_v26, 2  ;;  %s2182_s3 = smov [#allocation11]  }
  0x36   :  { %v2415_v61 = vperm.slane %v541_v57, 0  ;;  %v2419_v6 = vperm.slane %v541_v57, 1  ;;  %vm1829_vm15 = vcmp.gt.s32.totalorder %v2300_v14, 4  ;;  %vm1832_vm1 = vcmp.gt.s32.totalorder %v2325_v26, 5  ;;  %s1576_s5 = sshll.u32 %s2182_s3, 4  ;;  %s2183_s27 = smov [#allocation10]   ;;  %s1577_s5 = int_to_ptr.vmem [resolvable:$true] %s1576_s5 }
  0x37   :  { %702 = vmatpush.bf16.msrb.mxu3 %v2265_v19  ;;  %416 = vmatpush.bf16.msra.mxu2 %v1652_v60  ;;  %v2413_v60 = vperm.slane %v128_v56, 0  ;;  %vm1835_vm3 = vcmp.gt.s32.totalorder %v2300_v14, 7  ;;  %s1563_s28 = sshll.u32 %s2183_s27, 4  ;;  %s1565_s8 = sshll.u32 %s2866_s6, 4  ;;  %s1564_s28 = int_to_ptr.vmem [resolvable:$true] %s1563_s28  ;;  %s1566_s8 = int_to_ptr.hbm [resolvable:$true] %s1565_s8 }
  0x38   :  { %369 = vmatmul.bf16.vlgmr.msra.gmra.mxu1 %v2268_v28  ;;  %772 = vperm.xlu0 %1946, %v767_v30   ;;  %s2184_s7 = smov 128   ;;  %s2185_s9 = smov 8  }
  0x39   :  { %810 = vmatpush.bf16.msrb.mxu0 %v2265_v19  ;;  %823 = vmatpush.bf16.msrb.mxu1 %v2278_v49 }
  0x3b   :  { %703 = vmatpush.bf16.msrb.mxu3 %v2271_v32  ;;  %417 = vmatpush.bf16.msra.mxu2 %v1640_v9  ;;  %v2421_v9 = vperm.slane %v128_v56, 1 }
  0x3d   :  { %811 = vmatpush.bf16.msrb.mxu0 %v2271_v32  ;;  %824 = vmatpush.bf16.msrb.mxu1 %v2285_v59 }
  0x3e   :  { %418 = vmatmul.bf16.vlgmr.msra.gmra.mxu2 %v2268_v28  ;;  %v1759_v28 = vld [vmem:[#allocation9 + $0x38] sm:$0xf] }
  0x3f   :  { %704 = vmatpush.bf16.msrb.mxu3 %v2276_v44  ;;  %905 = vmatpush.bf16.msrb.mxu2 %v2238_v3  ;;  %v2336_v34 = vor.u32 %v1877_v29, %v1759_v28 }
  0x40   :  { %1098 = vperm.xlu0 %1946, %v1095_v37  }
  0x41   :  { %812 = vmatpush.bf16.msrb.mxu0 %v2276_v44  ;;  %825 = vmatpush.bf16.msrb.mxu1 %v2293_v7 }
  0x43   :  { %705 = vmatpush.bf16.msrb.mxu3 %v2283_v54  ;;  %906 = vmatpush.bf16.msrb.mxu2 %v2241_v5 }
  0x44   :  { %325 = vmatmul.bf16.gmra.mxu0 %v1838_v33 }
  0x45   :  { %813 = vmatpush.bf16.msrb.mxu0 %v2283_v54  ;;  %826 = vmatpush.bf16.msrb.mxu1 %v2310_v21 }
  0x47   :  { %706 = vmatpush.bf16.msrb.mxu3 %v2291_v63  ;;  %907 = vmatpush.bf16.msrb.mxu2 %v2244_v13 }
  0x48   :  { %374 = vmatmul.bf16.gmra.mxu1 %v1838_v33  ;;  %1211 = vperm.xlu0 %1946, %v1206_v43  }
  0x49   :  { %814 = vmatpush.bf16.msrb.mxu0 %v2291_v63  ;;  %827 = vmatpush.bf16.msrb.mxu1 %v2319_v25 }
  0x4b   :  { %707 = vmatpush.bf16.msrb.mxu3 %v2307_v15  ;;  %908 = vmatpush.bf16.msrb.mxu2 %v2247_v20 }
  0x4d   :  { %815 = vmatpush.bf16.msrb.mxu0 %v2307_v15  ;;  %828 = vmatpush.bf16.msrb.mxu1 %v2336_v34 }
  0x4e   :  { %423 = vmatmul.bf16.gmra.mxu2 %v1838_v33 }
  0x4f   :  { %708 = vmatpush.bf16.msrb.mxu3 %v2317_v24  ;;  %909 = vmatpush.bf16.msrb.mxu2 %v2250_v31 }
  0x50   :  { %1428 = vperm.xlu0 %1946, %v1425_v46   ;;  %v2429_v46 = vperm.slane %v128_v56, 2  ;;  %v875_v56 = vsel %vm1823_vm6, 1, %v2868_v12 }
  0x51   :  { %816 = vmatpush.bf16.msrb.mxu0 %v2317_v24  ;;  %829 = vmatpush.bf16.msrb.mxu1 %v2345_v38 }
  0x52   :  { %709 = vmatmul.bf16.vlgmr.msrb.gmra.mxu3 %v2180_v27  ;;  %878 = vperm.xlu1 %1947, %v875_v56  }
  0x53   :  { %715 = vmatpush.bf16.msra.mxu3 %v2278_v49  ;;  %910 = vmatpush.bf16.msrb.mxu2 %v2253_v40 }
  0x54   :  { %330 = vmatmul.bf16.gmra.mxu0 %v1839_v45 }
  0x55   :  { %933 = vmatpush.bf16.msra.mxu0 %v2278_v49  ;;  %830 = vmatpush.bf16.msrb.mxu1 %v2352_v42 }
  0x57   :  { %716 = vmatpush.bf16.msra.mxu3 %v2285_v59  ;;  %911 = vmatpush.bf16.msrb.mxu2 %v2256_v53 }
  0x58   :  { %379 = vmatmul.bf16.gmra.mxu1 %v1839_v45  ;;  %1541 = vperm.xlu0 %1946, %v1536_v47   ;;  %v2431_v47 = vperm.slane %v541_v57, 2 }
  0x59   :  { %934 = vmatpush.bf16.msra.mxu0 %v2285_v59  ;;  %1015 = vmatpush.bf16.msra.mxu1 %v2238_v3 }
  0x5b   :  { %717 = vmatpush.bf16.msra.mxu3 %v2293_v7  ;;  %912 = vmatpush.bf16.msrb.mxu2 %v2259_v2 }
  0x5d   :  { %935 = vmatpush.bf16.msra.mxu0 %v2293_v7  ;;  %1016 = vmatpush.bf16.msra.mxu1 %v2241_v5 }
  0x5e   :  { %428 = vmatmul.bf16.gmra.mxu2 %v1839_v45 }
  0x5f   :  { %718 = vmatpush.bf16.msra.mxu3 %v2310_v21  ;;  %1029 = vmatpush.bf16.msra.mxu2 %v2261_v8 }
  0x61   :  { %936 = vmatpush.bf16.msra.mxu0 %v2310_v21  ;;  %1017 = vmatpush.bf16.msra.mxu1 %v2244_v13 }
  0x63   :  { %719 = vmatpush.bf16.msra.mxu3 %v2319_v25  ;;  %1030 = vmatpush.bf16.msra.mxu2 %v2265_v19 }
  0x64   :  { %335 = vmatmul.bf16.gmra.mxu0 %v1840_v48 }
  0x65   :  { %937 = vmatpush.bf16.msra.mxu0 %v2319_v25  ;;  %1018 = vmatpush.bf16.msra.mxu1 %v2247_v20 }
  0x67   :  { %720 = vmatpush.bf16.msra.mxu3 %v2336_v34  ;;  %1031 = vmatpush.bf16.msra.mxu2 %v2271_v32 }
  0x68   :  { %384 = vmatmul.bf16.gmra.mxu1 %v1840_v48 }
  0x69   :  { %938 = vmatpush.bf16.msra.mxu0 %v2336_v34  ;;  %1019 = vmatpush.bf16.msra.mxu1 %v2250_v31 }
  0x6b   :  { %721 = vmatpush.bf16.msra.mxu3 %v2345_v38  ;;  %1032 = vmatpush.bf16.msra.mxu2 %v2276_v44 }
  0x6d   :  { %939 = vmatpush.bf16.msra.mxu0 %v2345_v38  ;;  %1020 = vmatpush.bf16.msra.mxu1 %v2253_v40 }
  0x6e   :  { %433 = vmatmul.bf16.gmra.mxu2 %v1840_v48 }
  0x6f   :  { %722 = vmatpush.bf16.msra.mxu3 %v2352_v42  ;;  %1033 = vmatpush.bf16.msra.mxu2 %v2283_v54 }
  0x71   :  { %940 = vmatpush.bf16.msra.mxu0 %v2352_v42  ;;  %1021 = vmatpush.bf16.msra.mxu1 %v2256_v53 }
  0x72   :  { %723 = vmatmul.bf16.vlgmr.msra.gmra.mxu3 %v2180_v27  ;;  %v1841_v27 = vld [vmem:[#allocation4 + $0x20] sm:$0xff] }
  0x73   :  { %795 = vmatpush.bf16.msrb.mxu3 %v2238_v3  ;;  %1034 = vmatpush.bf16.msra.mxu2 %v2291_v63 }
  0x74   :  { %340 = vmatmul.bf16.gmra.mxu0 %v1841_v27 }
  0x75   :  { %1022 = vmatpush.bf16.msra.mxu1 %v2259_v2 }
  0x77   :  { %796 = vmatpush.bf16.msrb.mxu3 %v2241_v5  ;;  %1035 = vmatpush.bf16.msra.mxu2 %v2307_v15 }
  0x78   :  { %389 = vmatmul.bf16.gmra.mxu1 %v1841_v27 }
  0x7b   :  { %797 = vmatpush.bf16.msrb.mxu3 %v2244_v13  ;;  %1036 = vmatpush.bf16.msra.mxu2 %v2317_v24 }
  0x7e   :  { %438 = vmatmul.bf16.gmra.mxu2 %v1841_v27 }
  0x7f   :  { %798 = vmatpush.bf16.msrb.mxu3 %v2247_v20 }
  0x83   :  { %799 = vmatpush.bf16.msrb.mxu3 %v2250_v31 }
  0x84   :  { %345 = vmatmul.bf16.gmra.mxu0 %v1842_v50 }
  0x87   :  { %800 = vmatpush.bf16.msrb.mxu3 %v2253_v40 }
  0x88   :  { %394 = vmatmul.bf16.gmra.mxu1 %v1842_v50 }
  0x8b   :  { %801 = vmatpush.bf16.msrb.mxu3 %v2256_v53 }
  0x8e   :  { %443 = vmatmul.bf16.gmra.mxu2 %v1842_v50 }
  0x8f   :  { %802 = vmatpush.bf16.msrb.mxu3 %v2259_v2 }
  0x93   :  { %919 = vmatpush.bf16.msra.mxu3 %v2261_v8 }
  0x94   :  { %350 = vmatmul.bf16.gmra.mxu0 %v1843_v52 }
  0x97   :  { %920 = vmatpush.bf16.msra.mxu3 %v2265_v19 }
  0x98   :  { %399 = vmatmul.bf16.gmra.mxu1 %v1843_v52 }
  0x9b   :  { %921 = vmatpush.bf16.msra.mxu3 %v2271_v32 }
  0x9e   :  { %448 = vmatmul.bf16.gmra.mxu2 %v1843_v52 }
  0x9f   :  { %922 = vmatpush.bf16.msra.mxu3 %v2276_v44 }
  0xa3   :  { %923 = vmatpush.bf16.msra.mxu3 %v2283_v54 }
  0xa4   :  { %355 = vmatmul.bf16.gmra.mxu0 %v1844_v18 }
  0xa7   :  { %924 = vmatpush.bf16.msra.mxu3 %v2291_v63 }
  0xa8   :  { %404 = vmatmul.bf16.gmra.mxu1 %v1844_v18 }
  0xab   :  { %925 = vmatpush.bf16.msra.mxu3 %v2307_v15 }
  0xae   :  { %453 = vmatmul.bf16.gmra.mxu2 %v1844_v18 }
  0xaf   :  { %926 = vmatpush.bf16.msra.mxu3 %v2317_v24 }
  0xb1   :  { %v321_v58 = vpop.f32.mrf.mxu0 }
  0xb2   :  { %v322_v62 = vadd.f32 %v321_v58, %v2413_v60 }
  0xb5   :  { %v696_v51 = vpop.f32.mrf.mxu3  ;;  %v370_v4 = vpop.f32.mrf.mxu1 }
  0xb6   :  { %v697_v0 = vadd.f32 %v696_v51, %v2415_v61  ;;  %v371_v17 = vadd.f32 %v370_v4, %v2421_v9 }
  0xb8   :  { %v729_v10 = vadd.f32 %v697_v0, %v322_v62 }
  0xb9   :  { %v323_v11 = vpop.f32.mrf.mxu0 }
  0xba   :  { %v731_v22 = vmul.f32 0.5, %v729_v10  ;;  %v324_v23 = vadd.f32 %v323_v11, %v2413_v60 }
  0xbc   :  { %1949 = vtanh.f32 %v731_v22 }
  0xbd   :  { %v698_v55 = vpop.f32.mrf.mxu3  ;;  %v372_v35 = vpop.f32.mrf.mxu1 }
  0xbe   :  { %v699_v28 = vadd.f32 %v698_v55, %v2415_v61  ;;  %v373_v39 = vadd.f32 %v372_v35, %v2421_v9 }
  0xc0   :  { %v730_v30 = vadd.f32 %v699_v28, %v324_v23  ;;  %v876_v28 = vsel %vm1824_vm7, 1, %v2868_v12 }
  0xc1   :  { %v419_v27 = vpop.f32.mrf.mxu2  ;;  %881 = vperm.xlu1 %1947, %v876_v28  }
  0xc2   :  { %v732_v41 = vmul.f32 0.5, %v730_v30  ;;  %v1950_v43 = vpop.eup %1949  ;;  %v420_v55 = vadd.f32 %v419_v27, %v2429_v46 }
  0xc3   :  { %v735_v48 = vadd.f32 1.0, %v1950_v43 }
  0xc5   :  { %v737_v62 = vmul.f32 0.5, %v735_v48  ;;  %v1096_v48 = vsel %vm1828_vm8, 1, %v2868_v12  ;;  %v375_v28 = vpop.f32.mrf.mxu1 }
  0xc9   :  { %1101 = vperm.xlu1 %1947, %v1096_v48  }
  0xd5   :  { %v710_v1 = vpop.f32.mrf.mxu3 }
  0xd6   :  { %v711_v16 = vadd.f32 %v710_v1, %v2419_v6 }
  0xd8   :  { %v739_v29 = vadd.f32 %v711_v16, %v371_v17  ;;  %v421_v16 = vpop.f32.mrf.mxu2 }
  0xda   :  { %v741_v36 = vmul.f32 0.5, %v739_v29  ;;  %v422_v29 = vadd.f32 %v421_v16, %v2429_v46 }
  0xdc   :  { %1951 = vtanh.f32 %v741_v36 }
  0xdd   :  { %v712_v33 = vpop.f32.mrf.mxu3  ;;  %1953 = vtanh.f32 %v732_v41 }
  0xde   :  { %v713_v37 = vadd.f32 %v712_v33, %v2419_v6 }
  0xe0   :  { %v740_v45 = vadd.f32 %v713_v37, %v373_v39  ;;  %v770_v39 = vpop.permute.xlu0 %769 }
  0xe1   :  { %vm774_vm9 = vcmp.eq.s32.totalorder %v770_v39, 1 }
  0xe2   :  { %v742_v50 = vmul.f32 0.5, %v740_v45  ;;  %v1952_v52 = vpop.eup %1951 }
  0xe3   :  { %v1954_v0 = vpop.eup %1953  ;;  %v745_v4 = vadd.f32 1.0, %v1952_v52 }
  0xe4   :  { %1955 = vtanh.f32 %v742_v50  ;;  %v736_v10 = vadd.f32 1.0, %v1954_v0  ;;  %v2443_v50 = vpop.f32.mrf.mxu0 }
  0xe5   :  { %v747_v11 = vmul.f32 0.5, %v745_v4  ;;  %v1315_v4 = vsel %vm1831_vm10, 1, %v2868_v12 }
  0xe6   :  { %v738_v23 = vmul.f32 0.5, %v736_v10  ;;  %1318 = vperm.xlu1 %1947, %v1315_v4  }
  0xe7   :  { %v755_v33 = vsub.f32 1.0, %v747_v11  ;;  %v759_v43 = vmul.f32 0.0, %v747_v11 }
  0xe8   :  { %v773_v0 = vpop.permute.xlu0 %772 }
  0xe9   :  { %vm775_vm11 = vcmp.eq.s32.totalorder %v773_v0, 1 }
  0xea   :  { %v1956_v18 = vpop.eup %1955 }
  0xeb   :  { %v746_v35 = vadd.f32 1.0, %v1956_v18 }
  0xec   :  { %v2457_v16 = vpop.f32.mrf.mxu0 }
  0xed   :  { %v748_v45 = vmul.f32 0.5, %v746_v35 }
  0xf5   :  { %v724_v51 = vpop.f32.mrf.mxu3 }
  0xf6   :  { %v725_v58 = vadd.f32 %v724_v51, %v2431_v47  ;;  %v756_v51 = vsub.f32 1.0, %v748_v45 }
  0xf8   :  { %v749_v1 = vmul.f32 %v737_v62, %v725_v58 }
  0xfa   :  { %v751_v57 = vadd.f32 %v749_v1, %v420_v55  ;;  %v760_v55 = vmul.f32 0.0, %v748_v45 }
  0xfc   :  { %1957 = vtanh.f32 %v751_v57 }
  0xfd   :  { %v726_v17 = vpop.f32.mrf.mxu3 }
  0xfe   :  { %v727_v22 = vadd.f32 %v726_v17, %v2431_v47 }
 0x100   :  { %v750_v30 = vmul.f32 %v738_v23, %v727_v22  ;;  %v1426_v23 = vsel %vm1834_vm12, 1, %v2868_v12  ;;  %v376_v12 = vadd.f32 %v375_v28, %v2421_v9  ;;  %v329_v28 = vadd.f32 %v2457_v16, %v2413_v60 }
 0x101   :  { %1431 = vperm.xlu1 %1947, %v1426_v23  }
 0x102   :  { %v1958_v36 = vpop.eup %1957  ;;  %v752_v37 = vadd.f32 %v750_v30, %v422_v29  ;;  %v2464_v29 = vpop.f32.mrf.mxu0 }
 0x103   :  { %v757_v41 = vmul.f32 %v1958_v36, %v755_v33  ;;  %v377_v30 = vpop.f32.mrf.mxu1 }
 0x104   :  { %1959 = vtanh.f32 %v752_v37 }
 0x105   :  { %v761_v27 = vadd.f32 %v759_v43, %v757_v41 }
 0x107   :  { %v2445_v62 = vsel %vm774_vm9, %v761_v27, 0.0 }
 0x108   :  { %v778_v56 = vpack.c.bf16 %v2445_v62, %v2445_v62 }
 0x10a   :  { %v1960_v52 = vpop.eup %1959  ;;  %v791_v17 = vunpack.c.l.b16 %v778_v56  ;;  %v2475_v33 = vpop.f32.mrf.mxu0 }
 0x10b   :  { %v758_v58 = vmul.f32 %v1960_v52, %v756_v51  ;;  %v2481_v35 = vpop.f32.mrf.mxu1 }
 0x10d   :  { %v762_v1 = vadd.f32 %v760_v55, %v758_v58 }
 0x10f   :  { %v2451_v57 = vsel %vm775_vm11, %v762_v1, 0.0 }
 0x110   :  { %v779_v10 = vpack.c.bf16 %v2451_v57, %v2451_v57  ;;  %v1896_v11 = vpack.c.bf16 %v2451_v57, %v2445_v62 }
 0x112   :  { %1897 = vst [vmem:[#allocation10] sm:$0xff] %v1896_v11   ;;  %v792_v18 = vunpack.c.l.b16 %v779_v10  ;;  %v2485_v36 = vpop.f32.mrf.mxu0 }
 0x113   :  { %v2493_v37 = vpop.f32.mrf.mxu1 }
 0x114   :  { %v793_v22 = vpack.c.b16 %v792_v18, %v791_v17 }
 0x116   :  { %803 = vmatmul.bf16.vlgmr.msrb.gmra.mxu3 %v793_v22  ;;  %817 = vmatmul.bf16.vlgmr.msrb.gmra.mxu0 %v793_v22 }
 0x117   :  { %831 = vmatmul.bf16.vlgmr.msrb.gmra.mxu1 %v793_v22  ;;  %1043 = vmatpush.bf16.msrb.mxu3 %v2278_v49 }
 0x118   :  { %1125 = vmatpush.bf16.msrb.mxu0 %v2238_v3  ;;  %1139 = vmatpush.bf16.msrb.mxu1 %v2261_v8 }
 0x11a   :  { %v2495_v39 = vpop.f32.mrf.mxu0 }
 0x11b   :  { %1044 = vmatpush.bf16.msrb.mxu3 %v2285_v59  ;;  %v2497_v41 = vpop.f32.mrf.mxu1 }
 0x11c   :  { %1126 = vmatpush.bf16.msrb.mxu0 %v2241_v5  ;;  %1140 = vmatpush.bf16.msrb.mxu1 %v2265_v19 }
 0x11f   :  { %1045 = vmatpush.bf16.msrb.mxu3 %v2293_v7 }
 0x120   :  { %1127 = vmatpush.bf16.msrb.mxu0 %v2244_v13  ;;  %1141 = vmatpush.bf16.msrb.mxu1 %v2271_v32 }
 0x122   :  { %v2499_v43 = vpop.f32.mrf.mxu0 }
 0x123   :  { %1046 = vmatpush.bf16.msrb.mxu3 %v2310_v21  ;;  %v2501_v45 = vpop.f32.mrf.mxu1 }
 0x124   :  { %1128 = vmatpush.bf16.msrb.mxu0 %v2247_v20  ;;  %1142 = vmatpush.bf16.msrb.mxu1 %v2276_v44 }
 0x127   :  { %1047 = vmatpush.bf16.msrb.mxu3 %v2319_v25 }
 0x128   :  { %1129 = vmatpush.bf16.msrb.mxu0 %v2250_v31  ;;  %1143 = vmatpush.bf16.msrb.mxu1 %v2283_v54 }
 0x12a   :  { %v2503_v48 = vpop.f32.mrf.mxu0 }
 0x12b   :  { %1048 = vmatpush.bf16.msrb.mxu3 %v2336_v34  ;;  %2870 = vst [vmem:[#allocation17_spill] sm:$0xff] %v2503_v48  ;;  %v2505_v27 = vpop.f32.mrf.mxu1 }
 0x12c   :  { %1130 = vmatpush.bf16.msrb.mxu0 %v2253_v40  ;;  %1144 = vmatpush.bf16.msrb.mxu1 %v2291_v63 }
 0x12f   :  { %1049 = vmatpush.bf16.msrb.mxu3 %v2345_v38 }
 0x130   :  { %1131 = vmatpush.bf16.msrb.mxu0 %v2256_v53  ;;  %1145 = vmatpush.bf16.msrb.mxu1 %v2307_v15 }
 0x132   :  { %v2507_v51 = vpop.f32.mrf.mxu0 }
 0x133   :  { %1050 = vmatpush.bf16.msrb.mxu3 %v2352_v42  ;;  %2871 = vst [vmem:[#allocation18_spill] sm:$0xff] %v2507_v51  ;;  %v2509_v52 = vpop.f32.mrf.mxu1 }
 0x134   :  { %1132 = vmatpush.bf16.msrb.mxu0 %v2259_v2  ;;  %1146 = vmatpush.bf16.msrb.mxu1 %v2317_v24  ;;  %2872 = vst [vmem:[#allocation19_spill] sm:$0xff] %v2509_v52 }
 0x13a   :  { %v2511_v55 = vpop.f32.mrf.mxu0 }
 0x13b   :  { %2873 = vst [vmem:[#allocation20_spill] sm:$0xff] %v2511_v55  ;;  %v2513_v58 = vpop.f32.mrf.mxu1  ;;  %v327_v55 = vadd.f32 %v2443_v50, %v2413_v60 }
 0x13c   :  { %2874 = vst [vmem:[#allocation21_spill] sm:$0xff] %v2513_v58 }
 0x142   :  { %v2515_v0 = vpop.f32.mrf.mxu0 }
 0x143   :  { %2875 = vst [vmem:[#allocation22_spill] sm:$0xff] %v2515_v0  ;;  %v2517_v1 = vpop.f32.mrf.mxu1 }
 0x144   :  { %2876 = vst [vmem:[#allocation23_spill] sm:$0xff] %v2517_v1 }
 0x14a   :  { %v2519_v56 = vpop.f32.mrf.mxu0 }
 0x14b   :  { %2877 = vst [vmem:[#allocation24_spill] sm:$0xff] %v2519_v56  ;;  %v2521_v4 = vpop.f32.mrf.mxu1 }
 0x14c   :  { %2878 = vst [vmem:[#allocation25_spill] sm:$0xff] %v2521_v4 }
 0x152   :  { %v2523_v10 = vpop.f32.mrf.mxu0 }
 0x153   :  { %2879 = vst [vmem:[#allocation26_spill] sm:$0xff] %v2523_v10  ;;  %v2525_v11 = vpop.f32.mrf.mxu1 }
 0x154   :  { %2880 = vst [vmem:[#allocation27_spill] sm:$0xff] %v2525_v11 }
 0x15a   :  { %v2527_v17 = vpop.f32.mrf.mxu0 }
 0x15b   :  { %2881 = vst [vmem:[#allocation28_spill] sm:$0xff] %v2527_v17  ;;  %v2529_v18 = vpop.f32.mrf.mxu1 }
 0x15c   :  { %2882 = vst [vmem:[#allocation29_spill] sm:$0xff] %v2529_v18 }
 0x163   :  { %v2535_v56 = vpop.f32.mrf.mxu1 }
 0x164   :  { %2883 = vst [vmem:[#allocation30_spill] sm:$0xff] %v2535_v56 }
 0x193   :  { %v818_v22 = vpop.f32.mrf.mxu0 }
 0x194   :  { %v819_v23 = vadd.f32 %v818_v22, %v2419_v6  ;;  %v378_v22 = vadd.f32 %v377_v30, %v2421_v9  ;;  %v832_v52 = vpop.f32.mrf.mxu1 }
 0x196   :  { %v847_v10 = vadd.f32 %v819_v23, %v376_v12 }
 0x198   :  { %v849_v17 = vmul.f32 0.5, %v847_v10 }
 0x199   :  { %v804_v0 = vpop.f32.mrf.mxu3 }
 0x19a   :  { %v805_v4 = vadd.f32 %v804_v0, %v2415_v61 }
 0x19b   :  { %v820_v11 = vpop.f32.mrf.mxu0 }
 0x19c   :  { %v837_v1 = vadd.f32 %v805_v4, %v327_v55  ;;  %v821_v18 = vadd.f32 %v820_v11, %v2419_v6  ;;  %v424_v4 = vpop.f32.mrf.mxu2 }
 0x19d   :  { %v425_v23 = vadd.f32 %v424_v4, %v2429_v46 }
 0x19e   :  { %v839_v51 = vmul.f32 0.5, %v837_v1  ;;  %v848_v56 = vadd.f32 %v821_v18, %v378_v22 }
 0x1a0   :  { %1961 = vtanh.f32 %v839_v51  ;;  %v850_v10 = vmul.f32 0.5, %v848_v56  ;;  %v833_v51 = vadd.f32 %v832_v52, %v2431_v47 }
 0x1a1   :  { %v806_v58 = vpop.f32.mrf.mxu3  ;;  %1963 = vtanh.f32 %v849_v17 }
 0x1a2   :  { %v807_v50 = vadd.f32 %v806_v58, %v2415_v61  ;;  %v2884_v58 = vmov 0  }
 0x1a3   :  { %v985_v17 = vsel %vm1825_vm13, 1, %v2884_v58 }
 0x1a4   :  { %v838_v0 = vadd.f32 %v807_v50, %v329_v28  ;;  %988 = vperm.xlu2 %1948, %v985_v17   ;;  %v834_v50 = vpop.f32.mrf.mxu1  ;;  %v426_v52 = vpop.f32.mrf.mxu2 }
 0x1a6   :  { %v1962_v12 = vpop.eup %1961  ;;  %v840_v55 = vmul.f32 0.5, %v838_v0 }
 0x1a7   :  { %v843_v1 = vadd.f32 1.0, %v1962_v12  ;;  %v1964_v11 = vpop.eup %1963 }
 0x1a8   :  { %1965 = vtanh.f32 %v840_v55  ;;  %v853_v18 = vadd.f32 1.0, %v1964_v11  ;;  %v835_v55 = vadd.f32 %v834_v50, %v2431_v47 }
 0x1a9   :  { %v845_v30 = vmul.f32 0.5, %v843_v1  ;;  %1967 = vtanh.f32 %v850_v10  ;;  %v986_v1 = vsel %vm1826_vm14, 1, %v2884_v58  ;;  %v427_v10 = vadd.f32 %v426_v52, %v2429_v46 }
 0x1aa   :  { %v855_v0 = vmul.f32 0.5, %v853_v18 }
 0x1ab   :  { %v857_v16 = vmul.f32 %v845_v30, %v833_v51 }
 0x1ac   :  { %v863_v11 = vsub.f32 1.0, %v855_v0  ;;  %991 = vperm.xlu2 %1948, %v986_v1   ;;  %v867_v17 = vmul.f32 %v855_v0, %v2445_v62  ;;  %v429_v14 = vpop.f32.mrf.mxu2 }
 0x1ad   :  { %v859_v22 = vadd.f32 %v857_v16, %v425_v23 }
 0x1ae   :  { %v1966_v28 = vpop.eup %1965 }
 0x1af   :  { %v844_v56 = vadd.f32 1.0, %v1966_v28  ;;  %1969 = vtanh.f32 %v859_v22  ;;  %v1968_v12 = vpop.eup %1967  ;;  %v879_v28 = vpop.permute.xlu1 %878 }
 0x1b0   :  { %v854_v30 = vadd.f32 1.0, %v1968_v12  ;;  %vm883_vm0 = vcmp.eq.s32.totalorder %v879_v28, 1 }
 0x1b1   :  { %v846_v4 = vmul.f32 0.5, %v844_v56  ;;  %v1205_v56 = vsel %vm1829_vm15, 1, %v2884_v58 }
 0x1b2   :  { %v856_v18 = vmul.f32 0.5, %v854_v30 }
 0x1b3   :  { %v858_v51 = vmul.f32 %v846_v4, %v835_v55 }
 0x1b4   :  { %v864_v48 = vsub.f32 1.0, %v856_v18  ;;  %1208 = vperm.xlu2 %1948, %v1205_v56   ;;  %v868_v12 = vmul.f32 %v856_v18, %v2451_v57 }
 0x1b5   :  { %v1970_v23 = vpop.eup %1969  ;;  %v860_v16 = vadd.f32 %v858_v51, %v427_v10  ;;  %v1316_v51 = vsel %vm1832_vm1, 1, %v2884_v58 }
 0x1b6   :  { %v865_v22 = vmul.f32 %v1970_v23, %v863_v11 }
 0x1b7   :  { %1971 = vtanh.f32 %v860_v16  ;;  %v882_v0 = vpop.permute.xlu1 %881  ;;  %v1535_v16 = vsel %vm1835_vm3, 1, %v2884_v58 }
 0x1b8   :  { %v869_v50 = vadd.f32 %v867_v17, %v865_v22  ;;  %vm884_vm2 = vcmp.eq.s32.totalorder %v882_v0, 1 }
 0x1ba   :  { %v2556_v4 = vsel %vm883_vm0, %v869_v50, %v2445_v62 }
 0x1bb   :  { %v887_v10 = vpack.c.bf16 %v2556_v4, %v2556_v4 }
 0x1bc   :  { %1321 = vperm.xlu2 %1948, %v1316_v51   ;;  %v381_v51 = vadd.f32 %v2481_v35, %v2421_v9 }
 0x1bd   :  { %v1972_v52 = vpop.eup %1971  ;;  %v901_v26 = vunpack.c.l.b16 %v887_v10  ;;  %v332_v10 = vadd.f32 %v2464_v29, %v2413_v60  ;;  %v383_v29 = vadd.f32 %v2493_v37, %v2421_v9 }
 0x1be   :  { %v866_v55 = vmul.f32 %v1972_v52, %v864_v48 }
 0x1c0   :  { %v870_v1 = vadd.f32 %v868_v12, %v866_v55 }
 0x1c2   :  { %v2563_v11 = vsel %vm884_vm2, %v870_v1, %v2451_v57  ;;  %v431_v57 = vpop.f32.mrf.mxu2 }
 0x1c3   :  { %v888_v30 = vpack.c.bf16 %v2563_v11, %v2563_v11  ;;  %v1901_v62 = vpack.c.bf16 %v2563_v11, %v2556_v4 }
 0x1c4   :  { %1538 = vperm.xlu2 %1948, %v1535_v16  }
 0x1c5   :  { %1902 = vst [vmem:[#allocation10 + $0x8] sm:$0xff] %v1901_v62   ;;  %v902_v48 = vunpack.c.l.b16 %v888_v30 }
 0x1c7   :  { %v903_v23 = vpack.c.b16 %v902_v48, %v901_v26 }
 0x1c9   :  { %913 = vmatmul.bf16.vlgmr.msrb.gmra.mxu2 %v903_v23  ;;  %927 = vmatmul.bf16.vlgmr.msra.gmra.mxu3 %v903_v23 }
 0x1ca   :  { %941 = vmatmul.bf16.vlgmr.msra.gmra.mxu0 %v903_v23  ;;  %1153 = vmatpush.bf16.msrb.mxu2 %v2278_v49  ;;  %v2595_v58 = vpop.f32.mrf.mxu2 }
 0x1cb   :  { %1235 = vmatpush.bf16.msra.mxu3 %v2238_v3  ;;  %1249 = vmatpush.bf16.msra.mxu0 %v2261_v8 }
 0x1ce   :  { %1154 = vmatpush.bf16.msrb.mxu2 %v2285_v59 }
 0x1cf   :  { %1236 = vmatpush.bf16.msra.mxu3 %v2241_v5  ;;  %1250 = vmatpush.bf16.msra.mxu0 %v2265_v19 }
 0x1d2   :  { %1155 = vmatpush.bf16.msrb.mxu2 %v2293_v7  ;;  %v2597_v17 = vpop.f32.mrf.mxu2 }
 0x1d3   :  { %1237 = vmatpush.bf16.msra.mxu3 %v2244_v13  ;;  %1251 = vmatpush.bf16.msra.mxu0 %v2271_v32 }
 0x1d6   :  { %1156 = vmatpush.bf16.msrb.mxu2 %v2310_v21 }
 0x1d7   :  { %1238 = vmatpush.bf16.msra.mxu3 %v2247_v20  ;;  %1252 = vmatpush.bf16.msra.mxu0 %v2276_v44 }
 0x1da   :  { %1157 = vmatpush.bf16.msrb.mxu2 %v2319_v25  ;;  %v2599_v28 = vpop.f32.mrf.mxu2 }
 0x1db   :  { %1239 = vmatpush.bf16.msra.mxu3 %v2250_v31  ;;  %1253 = vmatpush.bf16.msra.mxu0 %v2283_v54 }
 0x1de   :  { %1158 = vmatpush.bf16.msrb.mxu2 %v2336_v34 }
 0x1df   :  { %1240 = vmatpush.bf16.msra.mxu3 %v2253_v40  ;;  %1254 = vmatpush.bf16.msra.mxu0 %v2291_v63 }
 0x1e2   :  { %1159 = vmatpush.bf16.msrb.mxu2 %v2345_v38  ;;  %v2601_v22 = vpop.f32.mrf.mxu2 }
 0x1e3   :  { %1241 = vmatpush.bf16.msra.mxu3 %v2256_v53  ;;  %1255 = vmatpush.bf16.msra.mxu0 %v2307_v15 }
 0x1e6   :  { %1160 = vmatpush.bf16.msrb.mxu2 %v2352_v42 }
 0x1e7   :  { %1242 = vmatpush.bf16.msra.mxu3 %v2259_v2  ;;  %1256 = vmatpush.bf16.msra.mxu0 %v2317_v24 }
 0x1ea   :  { %v2603_v18 = vpop.f32.mrf.mxu2 }
 0x1eb   :  { %2885 = vst [vmem:[#allocation31_spill] sm:$0xff] %v2603_v18 }
 0x1f2   :  { %v2605_v50 = vpop.f32.mrf.mxu2 }
 0x1f3   :  { %2886 = vst [vmem:[#allocation32_spill] sm:$0xff] %v2605_v50  ;;  %v430_v50 = vadd.f32 %v429_v14, %v2429_v46 }
 0x1fa   :  { %v2607_v56 = vpop.f32.mrf.mxu2 }
 0x1fb   :  { %2887 = vst [vmem:[#allocation33_spill] sm:$0xff] %v2607_v56 }
 0x202   :  { %v2609_v52 = vpop.f32.mrf.mxu2 }
 0x203   :  { %2888 = vst [vmem:[#allocation34_spill] sm:$0xff] %v2609_v52 }
 0x20a   :  { %v2611_v12 = vpop.f32.mrf.mxu2 }
 0x20b   :  { %2889 = vst [vmem:[#allocation35_spill] sm:$0xff] %v2611_v12 }
 0x212   :  { %v2613_v55 = vpop.f32.mrf.mxu2 }
 0x213   :  { %2890 = vst [vmem:[#allocation36_spill] sm:$0xff] %v2613_v55  ;;  %v334_v55 = vadd.f32 %v2475_v33, %v2413_v60 }
 0x24c   :  { %v914_v0 = vpop.f32.mrf.mxu2  ;;  %v928_v1 = vpop.f32.mrf.mxu3 }
 0x24d   :  { %v915_v30 = vadd.f32 %v914_v0, %v2415_v61  ;;  %v929_v62 = vadd.f32 %v928_v1, %v2419_v6  ;;  %v942_v0 = vpop.f32.mrf.mxu0 }
 0x24f   :  { %v947_v26 = vadd.f32 %v915_v30, %v332_v10  ;;  %v957_v48 = vadd.f32 %v929_v62, %v381_v51 }
 0x251   :  { %v949_v23 = vmul.f32 0.5, %v947_v26  ;;  %v959_v16 = vmul.f32 0.5, %v957_v48 }
 0x253   :  { %1973 = vtanh.f32 %v949_v23  ;;  %v943_v23 = vadd.f32 %v942_v0, %v2431_v47 }
 0x254   :  { %v916_v12 = vpop.f32.mrf.mxu2  ;;  %v930_v52 = vpop.f32.mrf.mxu3  ;;  %1975 = vtanh.f32 %v959_v16 }
 0x255   :  { %v917_v56 = vadd.f32 %v916_v12, %v2415_v61  ;;  %v931_v35 = vadd.f32 %v930_v52, %v2419_v6  ;;  %v944_v16 = vpop.f32.mrf.mxu0 }
 0x257   :  { %v948_v1 = vadd.f32 %v917_v56, %v334_v55  ;;  %v958_v10 = vadd.f32 %v931_v35, %v383_v29  ;;  %v945_v35 = vadd.f32 %v944_v16, %v2431_v47 }
 0x259   :  { %v1974_v51 = vpop.eup %1973  ;;  %v950_v30 = vmul.f32 0.5, %v948_v1  ;;  %v960_v26 = vmul.f32 0.5, %v958_v10  ;;  %v432_v10 = vadd.f32 %v431_v57, %v2429_v46 }
 0x25a   :  { %v953_v62 = vadd.f32 1.0, %v1974_v51  ;;  %v1976_v48 = vpop.eup %1975 }
 0x25b   :  { %1977 = vtanh.f32 %v950_v30  ;;  %v963_v12 = vadd.f32 1.0, %v1976_v48 }
 0x25c   :  { %v955_v33 = vmul.f32 0.5, %v953_v62  ;;  %1979 = vtanh.f32 %v960_v26 }
 0x25d   :  { %v965_v55 = vmul.f32 0.5, %v963_v12 }
 0x25e   :  { %v967_v37 = vmul.f32 %v955_v33, %v943_v23  ;;  %v989_v23 = vpop.permute.xlu2 %988 }
 0x25f   :  { %v973_v0 = vsub.f32 1.0, %v965_v55  ;;  %vm993_vm4 = vcmp.eq.s32.totalorder %v989_v23, 1 }
 0x260   :  { %v969_v18 = vadd.f32 %v967_v37, %v430_v50  ;;  %v977_v50 = vmul.f32 %v965_v55, %v2556_v4 }
 0x261   :  { %v1978_v52 = vpop.eup %1977 }
 0x262   :  { %1981 = vtanh.f32 %v969_v18  ;;  %v954_v56 = vadd.f32 1.0, %v1978_v52  ;;  %v1980_v29 = vpop.eup %1979 }
 0x263   :  { %v964_v30 = vadd.f32 1.0, %v1980_v29 }
 0x264   :  { %v956_v1 = vmul.f32 0.5, %v954_v56 }
 0x265   :  { %v966_v18 = vmul.f32 0.5, %v964_v30 }
 0x266   :  { %v968_v51 = vmul.f32 %v956_v1, %v945_v35  ;;  %v992_v16 = vpop.permute.xlu2 %991 }
 0x267   :  { %v974_v33 = vsub.f32 1.0, %v966_v18  ;;  %v978_v52 = vmul.f32 %v966_v18, %v2563_v11  ;;  %vm994_vm5 = vcmp.eq.s32.totalorder %v992_v16, 1  ;;  %v339_v18 = vadd.f32 %v2495_v39, %v2413_v60 }
 0x268   :  { %v1982_v62 = vpop.eup %1981  ;;  %v970_v14 = vadd.f32 %v968_v51, %v432_v10 }
 0x269   :  { %v975_v26 = vmul.f32 %v1982_v62, %v973_v0  ;;  %v337_v0 = vadd.f32 %v2485_v36, %v2413_v60 }
 0x26a   :  { %1983 = vtanh.f32 %v970_v14 }
 0x26b   :  { %v979_v48 = vadd.f32 %v977_v50, %v975_v26  ;;  %v386_v26 = vadd.f32 %v2497_v41, %v2421_v9  ;;  %v388_v41 = vadd.f32 %v2501_v45, %v2421_v9 }
 0x26d   :  { %v2634_v57 = vsel %vm993_vm4, %v979_v48, %v2556_v4 }
 0x26e   :  { %v997_v29 = vpack.c.bf16 %v2634_v57, %v2634_v57 }
 0x270   :  { %v1984_v37 = vpop.eup %1983  ;;  %v1011_v10 = vunpack.c.l.b16 %v997_v29 }
 0x271   :  { %v976_v12 = vmul.f32 %v1984_v37, %v974_v33 }
 0x273   :  { %v980_v56 = vadd.f32 %v978_v52, %v976_v12 }
 0x275   :  { %v2639_v55 = vsel %vm994_vm5, %v980_v56, %v2563_v11 }
 0x276   :  { %v998_v35 = vpack.c.bf16 %v2639_v55, %v2639_v55  ;;  %v1906_v1 = vpack.c.bf16 %v2639_v55, %v2634_v57 }
 0x278   :  { %1907 = vst [vmem:[#allocation10 + $0x10] sm:$0xff] %v1906_v1   ;;  %v1012_v51 = vunpack.c.l.b16 %v998_v35 }
 0x27a   :  { %v1013_v4 = vpack.c.b16 %v1012_v51, %v1011_v10 }
 0x27c   :  { %1023 = vmatmul.bf16.vlgmr.msra.gmra.mxu1 %v1013_v4  ;;  %1037 = vmatmul.bf16.vlgmr.msra.gmra.mxu2 %v1013_v4 }
 0x27d   :  { %1051 = vmatmul.bf16.vlgmr.msrb.gmra.mxu3 %v1013_v4  ;;  %1263 = vmatpush.bf16.msra.mxu1 %v2278_v49  ;;  %v435_v4 = vadd.f32 %v2595_v58, %v2429_v46 }
 0x27e   :  { %1345 = vmatpush.bf16.msra.mxu2 %v2238_v3  ;;  %1359 = vmatpush.bf16.msrb.mxu3 %v2261_v8 }
 0x281   :  { %1264 = vmatpush.bf16.msra.mxu1 %v2285_v59 }
 0x282   :  { %1346 = vmatpush.bf16.msra.mxu2 %v2241_v5  ;;  %1360 = vmatpush.bf16.msrb.mxu3 %v2265_v19 }
 0x285   :  { %1265 = vmatpush.bf16.msra.mxu1 %v2293_v7 }
 0x286   :  { %1347 = vmatpush.bf16.msra.mxu2 %v2244_v13  ;;  %1361 = vmatpush.bf16.msrb.mxu3 %v2271_v32 }
 0x289   :  { %1266 = vmatpush.bf16.msra.mxu1 %v2310_v21 }
 0x28a   :  { %1348 = vmatpush.bf16.msra.mxu2 %v2247_v20  ;;  %1362 = vmatpush.bf16.msrb.mxu3 %v2276_v44 }
 0x28d   :  { %1267 = vmatpush.bf16.msra.mxu1 %v2319_v25 }
 0x28e   :  { %1349 = vmatpush.bf16.msra.mxu2 %v2250_v31  ;;  %1363 = vmatpush.bf16.msrb.mxu3 %v2283_v54 }
 0x291   :  { %1268 = vmatpush.bf16.msra.mxu1 %v2336_v34 }
 0x292   :  { %1350 = vmatpush.bf16.msra.mxu2 %v2253_v40  ;;  %1364 = vmatpush.bf16.msrb.mxu3 %v2291_v63 }
 0x295   :  { %1269 = vmatpush.bf16.msra.mxu1 %v2345_v38 }
 0x296   :  { %1351 = vmatpush.bf16.msra.mxu2 %v2256_v53  ;;  %1365 = vmatpush.bf16.msrb.mxu3 %v2307_v15 }
 0x299   :  { %1270 = vmatpush.bf16.msra.mxu1 %v2352_v42 }
 0x29a   :  { %1352 = vmatpush.bf16.msra.mxu2 %v2259_v2  ;;  %1366 = vmatpush.bf16.msrb.mxu3 %v2317_v24 }
 0x2f9   :  { %v1024_v11 = vpop.f32.mrf.mxu1 }
 0x2fa   :  { %v1025_v30 = vadd.f32 %v1024_v11, %v2415_v61 }
 0x2fc   :  { %v1057_v62 = vadd.f32 %v1025_v30, %v337_v0 }
 0x2fe   :  { %v1059_v14 = vmul.f32 0.5, %v1057_v62 }
 0x2ff   :  { %v1038_v23 = vpop.f32.mrf.mxu2 }
 0x300   :  { %1985 = vtanh.f32 %v1059_v14  ;;  %v1039_v50 = vadd.f32 %v1038_v23, %v2419_v6  ;;  %v1052_v36 = vpop.f32.mrf.mxu3 }
 0x301   :  { %v1026_v48 = vpop.f32.mrf.mxu1  ;;  %v1053_v10 = vadd.f32 %v1052_v36, %v2431_v47 }
 0x302   :  { %v1067_v33 = vadd.f32 %v1039_v50, %v386_v26  ;;  %v1027_v37 = vadd.f32 %v1026_v48, %v2415_v61 }
 0x304   :  { %v1069_v12 = vmul.f32 0.5, %v1067_v33  ;;  %v1058_v52 = vadd.f32 %v1027_v37, %v339_v18  ;;  %v437_v33 = vadd.f32 %v2597_v17, %v2429_v46 }
 0x306   :  { %v1986_v16 = vpop.eup %1985  ;;  %1987 = vtanh.f32 %v1069_v12  ;;  %v1060_v56 = vmul.f32 0.5, %v1058_v52 }
 0x307   :  { %v1063_v29 = vadd.f32 1.0, %v1986_v16  ;;  %v1040_v35 = vpop.f32.mrf.mxu2 }
 0x308   :  { %1989 = vtanh.f32 %v1060_v56  ;;  %v1041_v1 = vadd.f32 %v1040_v35, %v2419_v6  ;;  %v1054_v26 = vpop.f32.mrf.mxu3 }
 0x309   :  { %v1065_v39 = vmul.f32 0.5, %v1063_v29  ;;  %v1055_v48 = vadd.f32 %v1054_v26, %v2431_v47 }
 0x30a   :  { %v1068_v51 = vadd.f32 %v1041_v1, %v388_v41  ;;  %v1099_v1 = vpop.permute.xlu0 %1098 }
 0x30b   :  { %v1077_v11 = vmul.f32 %v1065_v39, %v1053_v10  ;;  %vm1103_vm6 = vcmp.eq.s32.totalorder %v1099_v1, 1 }
 0x30c   :  { %v1988_v0 = vpop.eup %1987  ;;  %v1070_v30 = vmul.f32 0.5, %v1068_v51 }
 0x30d   :  { %v1073_v62 = vadd.f32 1.0, %v1988_v0  ;;  %v1079_v14 = vadd.f32 %v1077_v11, %v435_v4  ;;  %v1102_v11 = vpop.permute.xlu1 %1101 }
 0x30e   :  { %v1990_v23 = vpop.eup %1989  ;;  %1991 = vtanh.f32 %v1070_v30  ;;  %vm1104_vm7 = vcmp.eq.s32.totalorder %v1102_v11, 1 }
 0x30f   :  { %1993 = vtanh.f32 %v1079_v14  ;;  %v1064_v45 = vadd.f32 1.0, %v1990_v23  ;;  %v1075_v50 = vmul.f32 0.5, %v1073_v62 }
 0x311   :  { %v1066_v18 = vmul.f32 0.5, %v1064_v45  ;;  %v1083_v58 = vsub.f32 1.0, %v1075_v50  ;;  %v1087_v56 = vmul.f32 %v1075_v50, %v2634_v57 }
 0x313   :  { %v1078_v37 = vmul.f32 %v1066_v18, %v1055_v48 }
 0x314   :  { %v1992_v12 = vpop.eup %1991 }
 0x315   :  { %v1994_v36 = vpop.eup %1993  ;;  %v1074_v52 = vadd.f32 1.0, %v1992_v12  ;;  %v1080_v16 = vadd.f32 %v1078_v37, %v437_v33 }
 0x316   :  { %v1085_v29 = vmul.f32 %v1994_v36, %v1083_v58 }
 0x317   :  { %1995 = vtanh.f32 %v1080_v16  ;;  %v1076_v41 = vmul.f32 0.5, %v1074_v52  ;;  %v440_v16 = vadd.f32 %v2599_v28, %v2429_v46 }
 0x318   :  { %v1089_v35 = vadd.f32 %v1087_v56, %v1085_v29 }
 0x319   :  { %v1084_v10 = vsub.f32 1.0, %v1076_v41  ;;  %v1088_v51 = vmul.f32 %v1076_v41, %v2639_v55 }
 0x31a   :  { %v2690_v17 = vsel %vm1103_vm6, %v1089_v35, %v2634_v57 }
 0x31b   :  { %v1107_v30 = vpack.c.bf16 %v2690_v17, %v2690_v17 }
 0x31d   :  { %v1996_v39 = vpop.eup %1995  ;;  %v1121_v26 = vunpack.c.l.b16 %v1107_v30 }
 0x31e   :  { %v1086_v4 = vmul.f32 %v1996_v39, %v1084_v10 }
 0x320   :  { %v1090_v0 = vadd.f32 %v1088_v51, %v1086_v4 }
 0x322   :  { %v2695_v62 = vsel %vm1104_vm7, %v1090_v0, %v2639_v55  ;;  %v442_v0 = vadd.f32 %v2601_v22, %v2429_v46 }
 0x323   :  { %v1108_v14 = vpack.c.bf16 %v2695_v62, %v2695_v62  ;;  %v1911_v23 = vpack.c.bf16 %v2695_v62, %v2690_v17 }
 0x325   :  { %1912 = vst [vmem:[#allocation10 + $0x18] sm:$0xff] %v1911_v23   ;;  %v1122_v45 = vunpack.c.l.b16 %v1108_v14 }
 0x327   :  { %v1123_v57 = vpack.c.b16 %v1122_v45, %v1121_v26 }
 0x329   :  { %1133 = vmatmul.bf16.vlgmr.msrb.gmra.mxu0 %v1123_v57  ;;  %1147 = vmatmul.bf16.vlgmr.msrb.gmra.mxu1 %v1123_v57 }
 0x32a   :  { %1161 = vmatmul.bf16.vlgmr.msrb.gmra.mxu2 %v1123_v57  ;;  %1373 = vmatpush.bf16.msrb.mxu0 %v2278_v49 }
 0x32b   :  { %1455 = vmatpush.bf16.msrb.mxu1 %v2238_v3  ;;  %1469 = vmatpush.bf16.msrb.mxu2 %v2261_v8 }
 0x32e   :  { %1374 = vmatpush.bf16.msrb.mxu0 %v2285_v59 }
 0x32f   :  { %1456 = vmatpush.bf16.msrb.mxu1 %v2241_v5  ;;  %1470 = vmatpush.bf16.msrb.mxu2 %v2265_v19 }
 0x332   :  { %1375 = vmatpush.bf16.msrb.mxu0 %v2293_v7 }
 0x333   :  { %1457 = vmatpush.bf16.msrb.mxu1 %v2244_v13  ;;  %1471 = vmatpush.bf16.msrb.mxu2 %v2271_v32  ;;  %v342_v13 = vadd.f32 %v2499_v43, %v2413_v60 }
 0x336   :  { %1376 = vmatpush.bf16.msrb.mxu0 %v2310_v21 }
 0x337   :  { %1458 = vmatpush.bf16.msrb.mxu1 %v2247_v20  ;;  %1472 = vmatpush.bf16.msrb.mxu2 %v2276_v44  ;;  %v391_v20 = vadd.f32 %v2505_v27, %v2421_v9 }
 0x33a   :  { %1377 = vmatpush.bf16.msrb.mxu0 %v2319_v25 }
 0x33b   :  { %1459 = vmatpush.bf16.msrb.mxu1 %v2250_v31  ;;  %1473 = vmatpush.bf16.msrb.mxu2 %v2283_v54  ;;  %v2891_v54 = vld [vmem:[#allocation17_spill] sm:$0xff] }
 0x33e   :  { %1378 = vmatpush.bf16.msrb.mxu0 %v2336_v34 }
 0x33f   :  { %1460 = vmatpush.bf16.msrb.mxu1 %v2253_v40  ;;  %1474 = vmatpush.bf16.msrb.mxu2 %v2291_v63  ;;  %v344_v63 = vadd.f32 %v2891_v54, %v2413_v60 }
 0x342   :  { %1379 = vmatpush.bf16.msrb.mxu0 %v2345_v38 }
 0x343   :  { %1461 = vmatpush.bf16.msrb.mxu1 %v2256_v53  ;;  %1475 = vmatpush.bf16.msrb.mxu2 %v2307_v15  ;;  %v2892_v15 = vld [vmem:[#allocation19_spill] sm:$0xff] }
 0x346   :  { %1380 = vmatpush.bf16.msrb.mxu0 %v2352_v42 }
 0x347   :  { %1462 = vmatpush.bf16.msrb.mxu1 %v2259_v2  ;;  %1476 = vmatpush.bf16.msrb.mxu2 %v2317_v24  ;;  %v393_v24 = vadd.f32 %v2892_v15, %v2421_v9 }
 0x3a6   :  { %v1134_v3 = vpop.f32.mrf.mxu0  ;;  %v1148_v5 = vpop.f32.mrf.mxu1 }
 0x3a7   :  { %v1135_v31 = vadd.f32 %v1134_v3, %v2415_v61  ;;  %v1149_v40 = vadd.f32 %v1148_v5, %v2419_v6 }
 0x3a9   :  { %v1167_v53 = vadd.f32 %v1135_v31, %v342_v13  ;;  %v1177_v8 = vadd.f32 %v1149_v40, %v391_v20  ;;  %v1209_v13 = vpop.permute.xlu2 %1208 }
 0x3aa   :  { %vm1213_vm8 = vcmp.eq.s32.totalorder %v1209_v13, 1 }
 0x3ab   :  { %v1169_v19 = vmul.f32 0.5, %v1167_v53  ;;  %v1179_v32 = vmul.f32 0.5, %v1177_v8  ;;  %v1212_v8 = vpop.permute.xlu0 %1211 }
 0x3ac   :  { %vm1214_vm9 = vcmp.eq.s32.totalorder %v1212_v8, 1 }
 0x3ad   :  { %1997 = vtanh.f32 %v1169_v19  ;;  %v1162_v55 = vpop.f32.mrf.mxu2 }
 0x3ae   :  { %v1136_v2 = vpop.f32.mrf.mxu0  ;;  %v1150_v44 = vpop.f32.mrf.mxu1  ;;  %1999 = vtanh.f32 %v1179_v32  ;;  %v1163_v36 = vadd.f32 %v1162_v55, %v2431_v47 }
 0x3af   :  { %v1137_v43 = vadd.f32 %v1136_v2, %v2415_v61  ;;  %v1151_v27 = vadd.f32 %v1150_v44, %v2419_v6 }
 0x3b1   :  { %v1168_v50 = vadd.f32 %v1137_v43, %v344_v63  ;;  %v1178_v48 = vadd.f32 %v1151_v27, %v393_v24  ;;  %v2893_v43 = vld [vmem:[#allocation21_spill] sm:$0xff] }
 0x3b3   :  { %v1998_v18 = vpop.eup %1997  ;;  %v1170_v33 = vmul.f32 0.5, %v1168_v50  ;;  %v1180_v12 = vmul.f32 0.5, %v1178_v48 }
 0x3b4   :  { %v1173_v37 = vadd.f32 1.0, %v1998_v18  ;;  %v2000_v58 = vpop.eup %1999 }
 0x3b5   :  { %2001 = vtanh.f32 %v1170_v33  ;;  %v1183_v29 = vadd.f32 1.0, %v2000_v58  ;;  %v1164_v1 = vpop.f32.mrf.mxu2 }
 0x3b6   :  { %v1175_v52 = vmul.f32 0.5, %v1173_v37  ;;  %2003 = vtanh.f32 %v1180_v12  ;;  %v1165_v4 = vadd.f32 %v1164_v1, %v2431_v47  ;;  %v2896_v37 = vld [vmem:[#allocation20_spill] sm:$0xff] }
 0x3b7   :  { %v1185_v39 = vmul.f32 0.5, %v1183_v29  ;;  %v349_v12 = vadd.f32 %v2896_v37, %v2413_v60 }
 0x3b8   :  { %v1187_v56 = vmul.f32 %v1175_v52, %v1163_v36 }
 0x3b9   :  { %v1193_v14 = vsub.f32 1.0, %v1185_v39  ;;  %v1197_v45 = vmul.f32 %v1185_v39, %v2690_v17 }
 0x3ba   :  { %v1189_v35 = vadd.f32 %v1187_v56, %v440_v16 }
 0x3bb   :  { %v2002_v41 = vpop.eup %2001 }
 0x3bc   :  { %2005 = vtanh.f32 %v1189_v35  ;;  %v1174_v10 = vadd.f32 1.0, %v2002_v41  ;;  %v2004_v51 = vpop.eup %2003 }
 0x3bd   :  { %v1184_v23 = vadd.f32 1.0, %v2004_v51  ;;  %v2897_v51 = vld [vmem:[#allocation31_spill] sm:$0xff] }
 0x3be   :  { %v1176_v11 = vmul.f32 0.5, %v1174_v10 }
 0x3bf   :  { %v1186_v5 = vmul.f32 0.5, %v1184_v23 }
 0x3c0   :  { %v1188_v30 = vmul.f32 %v1176_v11, %v1165_v4  ;;  %v445_v4 = vadd.f32 %v2897_v51, %v2429_v46 }
 0x3c1   :  { %v1194_v20 = vsub.f32 1.0, %v1186_v5  ;;  %v1198_v40 = vmul.f32 %v1186_v5, %v2695_v62  ;;  %v2898_v5 = vld [vmem:[#allocation32_spill] sm:$0xff] }
 0x3c2   :  { %v2006_v28 = vpop.eup %2005  ;;  %v1190_v26 = vadd.f32 %v1188_v30, %v442_v0  ;;  %v447_v13 = vadd.f32 %v2898_v5, %v2429_v46 }
 0x3c3   :  { %v1195_v57 = vmul.f32 %v2006_v28, %v1193_v14 }
 0x3c4   :  { %2007 = vtanh.f32 %v1190_v26 }
 0x3c5   :  { %v1199_v3 = vadd.f32 %v1197_v45, %v1195_v57 }
 0x3c7   :  { %v2746_v22 = vsel %vm1213_vm8, %v1199_v3, %v2690_v17 }
 0x3c8   :  { %v1217_v32 = vpack.c.bf16 %v2746_v22, %v2746_v22 }
 0x3ca   :  { %v2008_v31 = vpop.eup %2007  ;;  %v1231_v63 = vunpack.c.l.b16 %v1217_v32 }
 0x3cb   :  { %v1196_v53 = vmul.f32 %v2008_v31, %v1194_v20 }
 0x3cd   :  { %v1200_v19 = vadd.f32 %v1198_v40, %v1196_v53 }
 0x3cf   :  { %v2751_v2 = vsel %vm1214_vm9, %v1200_v19, %v2695_v62 }
 0x3d0   :  { %v1218_v44 = vpack.c.bf16 %v2751_v2, %v2751_v2  ;;  %v1916_v54 = vpack.c.bf16 %v2751_v2, %v2746_v22 }
 0x3d2   :  { %1917 = vst [vmem:[#allocation10 + $0x20] sm:$0xff] %v1916_v54   ;;  %v1232_v15 = vunpack.c.l.b16 %v1218_v44 }
 0x3d4   :  { %v1233_v17 = vpack.c.b16 %v1232_v15, %v1231_v63  ;;  %v1319_v63 = vpop.permute.xlu1 %1318 }
 0x3d5   :  { %vm1323_vm10 = vcmp.eq.s32.totalorder %v1319_v63, 1 }
 0x3d6   :  { %1243 = vmatmul.bf16.vlgmr.msra.gmra.mxu3 %v1233_v17  ;;  %1257 = vmatmul.bf16.vlgmr.msra.gmra.mxu0 %v1233_v17 }
 0x3d7   :  { %1271 = vmatmul.bf16.vlgmr.msra.gmra.mxu1 %v1233_v17  ;;  %1483 = vmatpush.bf16.msra.mxu3 %v2278_v49  ;;  %v396_v49 = vadd.f32 %v2893_v43, %v2421_v9 }
 0x3db   :  { %1484 = vmatpush.bf16.msra.mxu3 %v2285_v59  ;;  %v2894_v59 = vld [vmem:[#allocation18_spill] sm:$0xff] }
 0x3df   :  { %1485 = vmatpush.bf16.msra.mxu3 %v2293_v7  ;;  %v347_v7 = vadd.f32 %v2894_v59, %v2413_v60 }
 0x3e3   :  { %1486 = vmatpush.bf16.msra.mxu3 %v2310_v21 }
 0x3e7   :  { %1487 = vmatpush.bf16.msra.mxu3 %v2319_v25 }
 0x3eb   :  { %1488 = vmatpush.bf16.msra.mxu3 %v2336_v34 }
 0x3ef   :  { %1489 = vmatpush.bf16.msra.mxu3 %v2345_v38 }
 0x3f3   :  { %1490 = vmatpush.bf16.msra.mxu3 %v2352_v42  ;;  %v2895_v42 = vld [vmem:[#allocation23_spill] sm:$0xff] }
 0x3f4   :  { %v398_v18 = vadd.f32 %v2895_v42, %v2421_v9 }
 0x453   :  { %v1258_v62 = vpop.f32.mrf.mxu0 }
 0x454   :  { %v1259_v24 = vadd.f32 %v1258_v62, %v2419_v6  ;;  %v1272_v52 = vpop.f32.mrf.mxu1 }
 0x455   :  { %v1273_v10 = vadd.f32 %v1272_v52, %v2431_v47 }
 0x456   :  { %v1287_v55 = vadd.f32 %v1259_v24, %v396_v49  ;;  %v1322_v49 = vpop.permute.xlu2 %1321 }
 0x457   :  { %vm1324_vm11 = vcmp.eq.s32.totalorder %v1322_v49, 1 }
 0x458   :  { %v1289_v48 = vmul.f32 0.5, %v1287_v55 }
 0x459   :  { %v1244_v27 = vpop.f32.mrf.mxu3 }
 0x45a   :  { %v1245_v21 = vadd.f32 %v1244_v27, %v2415_v61 }
 0x45b   :  { %v1260_v50 = vpop.f32.mrf.mxu0 }
 0x45c   :  { %v1277_v25 = vadd.f32 %v1245_v21, %v347_v7  ;;  %v1261_v38 = vadd.f32 %v1260_v50, %v2419_v6  ;;  %v1274_v23 = vpop.f32.mrf.mxu1 }
 0x45d   :  { %v1275_v57 = vadd.f32 %v1274_v23, %v2431_v47 }
 0x45e   :  { %v1279_v34 = vmul.f32 0.5, %v1277_v25  ;;  %v1288_v36 = vadd.f32 %v1261_v38, %v398_v18  ;;  %v2899_v38 = vld [vmem:[#allocation22_spill] sm:$0xff] }
 0x45f   :  { %v352_v42 = vadd.f32 %v2899_v38, %v2413_v60 }
 0x460   :  { %2009 = vtanh.f32 %v1279_v34  ;;  %v1290_v41 = vmul.f32 0.5, %v1288_v36 }
 0x461   :  { %v1246_v33 = vpop.f32.mrf.mxu3  ;;  %2011 = vtanh.f32 %v1289_v48 }
 0x462   :  { %v1247_v58 = vadd.f32 %v1246_v33, %v2415_v61 }
 0x464   :  { %v1278_v16 = vadd.f32 %v1247_v58, %v349_v12 }
 0x466   :  { %v2010_v56 = vpop.eup %2009  ;;  %v1280_v29 = vmul.f32 0.5, %v1278_v16 }
 0x467   :  { %v1283_v35 = vadd.f32 1.0, %v2010_v56  ;;  %v2012_v1 = vpop.eup %2011 }
 0x468   :  { %2013 = vtanh.f32 %v1280_v29  ;;  %v1293_v0 = vadd.f32 1.0, %v2012_v1  ;;  %v2901_v29 = vld [vmem:[#allocation24_spill] sm:$0xff] }
 0x469   :  { %v1285_v39 = vmul.f32 0.5, %v1283_v35  ;;  %2015 = vtanh.f32 %v1290_v41  ;;  %v354_v35 = vadd.f32 %v2901_v29, %v2413_v60  ;;  %v2902_v41 = vld [vmem:[#allocation27_spill] sm:$0xff] }
 0x46a   :  { %v1295_v26 = vmul.f32 0.5, %v1293_v0  ;;  %v403_v1 = vadd.f32 %v2902_v41, %v2421_v9 }
 0x46b   :  { %v1297_v11 = vmul.f32 %v1285_v39, %v1273_v10 }
 0x46c   :  { %v1303_v31 = vsub.f32 1.0, %v1295_v26  ;;  %v1307_v19 = vmul.f32 %v1295_v26, %v2746_v22 }
 0x46d   :  { %v1299_v30 = vadd.f32 %v1297_v11, %v445_v4 }
 0x46e   :  { %v2014_v14 = vpop.eup %2013 }
 0x46f   :  { %2017 = vtanh.f32 %v1299_v30  ;;  %v1284_v28 = vadd.f32 1.0, %v2014_v14  ;;  %v2016_v45 = vpop.eup %2015 }
 0x470   :  { %v1294_v40 = vadd.f32 1.0, %v2016_v45 }
 0x471   :  { %v1286_v3 = vmul.f32 0.5, %v1284_v28 }
 0x472   :  { %v1296_v44 = vmul.f32 0.5, %v1294_v40 }
 0x473   :  { %v1298_v20 = vmul.f32 %v1286_v3, %v1275_v57  ;;  %v2903_v57 = vld [vmem:[#allocation33_spill] sm:$0xff] }
 0x474   :  { %v1304_v15 = vsub.f32 1.0, %v1296_v44  ;;  %v1308_v62 = vmul.f32 %v1296_v44, %v2751_v2  ;;  %v450_v3 = vadd.f32 %v2903_v57, %v2429_v46 }
 0x475   :  { %v2018_v53 = vpop.eup %2017  ;;  %v1300_v8 = vadd.f32 %v1298_v20, %v447_v13 }
 0x476   :  { %v1305_v32 = vmul.f32 %v2018_v53, %v1303_v31 }
 0x477   :  { %2019 = vtanh.f32 %v1300_v8 }
 0x478   :  { %v1309_v54 = vadd.f32 %v1307_v19, %v1305_v32 }
 0x47a   :  { %v2786_v43 = vsel %vm1323_vm10, %v1309_v54, %v2746_v22  ;;  %v2904_v54 = vld [vmem:[#allocation34_spill] sm:$0xff] }
 0x47b   :  { %v1327_v59 = vpack.c.bf16 %v2786_v43, %v2786_v43  ;;  %v452_v63 = vadd.f32 %v2904_v54, %v2429_v46 }
 0x47d   :  { %v2020_v17 = vpop.eup %2019  ;;  %v1341_v25 = vunpack.c.l.b16 %v1327_v59 }
 0x47e   :  { %v1306_v24 = vmul.f32 %v2020_v17, %v1304_v15 }
 0x480   :  { %v1310_v27 = vadd.f32 %v1308_v62, %v1306_v24 }
 0x482   :  { %v2791_v7 = vsel %vm1324_vm11, %v1310_v27, %v2751_v2  ;;  %v2900_v2 = vld [vmem:[#allocation25_spill] sm:$0xff] }
 0x483   :  { %v1328_v21 = vpack.c.bf16 %v2791_v7, %v2791_v7  ;;  %v1921_v55 = vpack.c.bf16 %v2791_v7, %v2786_v43  ;;  %v401_v18 = vadd.f32 %v2900_v2, %v2421_v9 }
 0x485   :  { %1922 = vst [vmem:[#allocation10 + $0x28] sm:$0xff] %v1921_v55   ;;  %v1342_v50 = vunpack.c.l.b16 %v1328_v21 }
 0x487   :  { %v1343_v22 = vpack.c.b16 %v1342_v50, %v1341_v25  ;;  %v1429_v25 = vpop.permute.xlu0 %1428 }
 0x488   :  { %vm1433_vm12 = vcmp.eq.s32.totalorder %v1429_v25, 1 }
 0x489   :  { %1353 = vmatmul.bf16.vlgmr.msra.gmra.mxu2 %v1343_v22  ;;  %1367 = vmatmul.bf16.vlgmr.msrb.gmra.mxu3 %v1343_v22 }
 0x48a   :  { %1381 = vmatmul.bf16.vlgmr.msrb.gmra.mxu0 %v1343_v22 }
 0x507   :  { %v1382_v51 = vpop.f32.mrf.mxu0 }
 0x508   :  { %v1383_v26 = vadd.f32 %v1382_v51, %v2431_v47 }
 0x50c   :  { %v1354_v34 = vpop.f32.mrf.mxu2  ;;  %v1368_v48 = vpop.f32.mrf.mxu3 }
 0x50d   :  { %v1355_v33 = vadd.f32 %v1354_v34, %v2415_v61  ;;  %v1369_v37 = vadd.f32 %v1368_v48, %v2419_v6  ;;  %v1432_v34 = vpop.permute.xlu1 %1431 }
 0x50e   :  { %vm1434_vm13 = vcmp.eq.s32.totalorder %v1432_v34, 1 }
 0x50f   :  { %v1387_v12 = vadd.f32 %v1355_v33, %v352_v42  ;;  %v1397_v58 = vadd.f32 %v1369_v37, %v401_v18  ;;  %v1384_v40 = vpop.f32.mrf.mxu0 }
 0x510   :  { %v1385_v32 = vadd.f32 %v1384_v40, %v2431_v47 }
 0x511   :  { %v1389_v36 = vmul.f32 0.5, %v1387_v12  ;;  %v1399_v52 = vmul.f32 0.5, %v1397_v58 }
 0x513   :  { %2021 = vtanh.f32 %v1389_v36 }
 0x514   :  { %v1356_v16 = vpop.f32.mrf.mxu2  ;;  %v1370_v56 = vpop.f32.mrf.mxu3  ;;  %2023 = vtanh.f32 %v1399_v52 }
 0x515   :  { %v1357_v10 = vadd.f32 %v1356_v16, %v2415_v61  ;;  %v1371_v39 = vadd.f32 %v1370_v56, %v2419_v6  ;;  %v2905_v16 = vld [vmem:[#allocation26_spill] sm:$0xff] }
 0x516   :  { %v357_v56 = vadd.f32 %v2905_v16, %v2413_v60 }
 0x517   :  { %v1388_v4 = vadd.f32 %v1357_v10, %v354_v35  ;;  %v1398_v11 = vadd.f32 %v1371_v39, %v403_v1  ;;  %v2906_v1 = vld [vmem:[#allocation29_spill] sm:$0xff] }
 0x518   :  { %v406_v10 = vadd.f32 %v2906_v1, %v2421_v9 }
 0x519   :  { %v2022_v0 = vpop.eup %2021  ;;  %v1390_v30 = vmul.f32 0.5, %v1388_v4  ;;  %v1400_v23 = vmul.f32 0.5, %v1398_v11  ;;  %v2907_v4 = vld [vmem:[#allocation28_spill] sm:$0xff] }
 0x51a   :  { %v1393_v14 = vadd.f32 1.0, %v2022_v0  ;;  %v2024_v28 = vpop.eup %2023  ;;  %v359_v11 = vadd.f32 %v2907_v4, %v2413_v60 }
 0x51b   :  { %2025 = vtanh.f32 %v1390_v30  ;;  %v1403_v13 = vadd.f32 1.0, %v2024_v28 }
 0x51c   :  { %v1395_v45 = vmul.f32 0.5, %v1393_v14  ;;  %2027 = vtanh.f32 %v1400_v23 }
 0x51d   :  { %v1405_v8 = vmul.f32 0.5, %v1403_v13 }
 0x51e   :  { %v1407_v5 = vmul.f32 %v1395_v45, %v1383_v26 }
 0x51f   :  { %v1413_v17 = vsub.f32 1.0, %v1405_v8  ;;  %v1417_v59 = vmul.f32 %v1405_v8, %v2786_v43 }
 0x520   :  { %v1409_v20 = vadd.f32 %v1407_v5, %v450_v3  ;;  %v2908_v5 = vld [vmem:[#allocation30_spill] sm:$0xff] }
 0x521   :  { %v2026_v31 = vpop.eup %2025  ;;  %v408_v13 = vadd.f32 %v2908_v5, %v2421_v9 }
 0x522   :  { %2029 = vtanh.f32 %v1409_v20  ;;  %v1394_v53 = vadd.f32 1.0, %v2026_v31  ;;  %v2028_v19 = vpop.eup %2027 }
 0x523   :  { %v1404_v62 = vadd.f32 1.0, %v2028_v19 }
 0x524   :  { %v1396_v44 = vmul.f32 0.5, %v1394_v53 }
 0x525   :  { %v1406_v55 = vmul.f32 0.5, %v1404_v62 }
 0x526   :  { %v1408_v15 = vmul.f32 %v1396_v44, %v1385_v32 }
 0x527   :  { %v1414_v50 = vsub.f32 1.0, %v1406_v55  ;;  %v1418_v42 = vmul.f32 %v1406_v55, %v2791_v7 }
 0x528   :  { %v2030_v24 = vpop.eup %2029  ;;  %v1410_v49 = vadd.f32 %v1408_v15, %v452_v63 }
 0x529   :  { %v1415_v27 = vmul.f32 %v2030_v24, %v1413_v17  ;;  %v2910_v24 = vld [vmem:[#allocation36_spill] sm:$0xff] }
 0x52a   :  { %2031 = vtanh.f32 %v1410_v49  ;;  %v457_v49 = vadd.f32 %v2910_v24, %v2429_v46 }
 0x52b   :  { %v1419_v21 = vadd.f32 %v1417_v59, %v1415_v27 }
 0x52d   :  { %v2817_v48 = vsel %vm1433_vm12, %v1419_v21, %v2786_v43 }
 0x52e   :  { %v1437_v18 = vpack.c.bf16 %v2817_v48, %v2817_v48 }
 0x530   :  { %v2032_v22 = vpop.eup %2031  ;;  %v1451_v43 = vunpack.c.l.b16 %v1437_v18 }
 0x531   :  { %v1416_v38 = vmul.f32 %v2032_v22, %v1414_v50  ;;  %v1539_v22 = vpop.permute.xlu2 %1538 }
 0x532   :  { %vm1543_vm14 = vcmp.eq.s32.totalorder %v1539_v22, 1 }
 0x533   :  { %v1420_v2 = vadd.f32 %v1418_v42, %v1416_v38 }
 0x535   :  { %v2823_v33 = vsel %vm1434_vm13, %v1420_v2, %v2791_v7 }
 0x536   :  { %v1926_v37 = vpack.c.bf16 %v2823_v33, %v2817_v48  ;;  %v1438_v12 = vpack.c.bf16 %v2823_v33, %v2823_v33 }
 0x538   :  { %1927 = vst [vmem:[#allocation10 + $0x30] sm:$0xff] %v1926_v37   ;;  %v1452_v58 = vunpack.c.l.b16 %v1438_v12 }
 0x53a   :  { %v1453_v36 = vpack.c.b16 %v1452_v58, %v1451_v43 }
 0x53c   :  { %1463 = vmatmul.bf16.vlgmr.msrb.gmra.mxu1 %v1453_v36  ;;  %1477 = vmatmul.bf16.vlgmr.msrb.gmra.mxu2 %v1453_v36 }
 0x53d   :  { %1491 = vmatmul.bf16.vlgmr.msra.gmra.mxu3 %v1453_v36 }
 0x5b9   :  { %v1464_v52 = vpop.f32.mrf.mxu1 }
 0x5ba   :  { %v1465_v7 = vadd.f32 %v1464_v52, %v2415_v61 }
 0x5bc   :  { %v1497_v29 = vadd.f32 %v1465_v7, %v357_v56 }
 0x5be   :  { %v1499_v35 = vmul.f32 0.5, %v1497_v29 }
 0x5bf   :  { %v1478_v41 = vpop.f32.mrf.mxu2 }
 0x5c0   :  { %2033 = vtanh.f32 %v1499_v35  ;;  %v1479_v39 = vadd.f32 %v1478_v41, %v2419_v6  ;;  %v1492_v23 = vpop.f32.mrf.mxu3 }
 0x5c1   :  { %v1466_v51 = vpop.f32.mrf.mxu1  ;;  %v1493_v31 = vadd.f32 %v1492_v23, %v2431_v47 }
 0x5c2   :  { %v1507_v0 = vadd.f32 %v1479_v39, %v406_v10  ;;  %v1467_v30 = vadd.f32 %v1466_v51, %v2415_v61  ;;  %v2909_v61 = vld [vmem:[#allocation35_spill] sm:$0xff] }
 0x5c3   :  { %v455_v53 = vadd.f32 %v2909_v61, %v2429_v46  ;;  %v1542_v46 = vpop.permute.xlu0 %1541 }
 0x5c4   :  { %v1509_v14 = vmul.f32 0.5, %v1507_v0  ;;  %v1498_v28 = vadd.f32 %v1467_v30, %v359_v11  ;;  %vm1544_vm15 = vcmp.eq.s32.totalorder %v1542_v46, 1 }
 0x5c6   :  { %v2034_v26 = vpop.eup %2033  ;;  %2035 = vtanh.f32 %v1509_v14  ;;  %v1500_v45 = vmul.f32 0.5, %v1498_v28 }
 0x5c7   :  { %v1503_v57 = vadd.f32 1.0, %v2034_v26  ;;  %v1480_v3 = vpop.f32.mrf.mxu2 }
 0x5c8   :  { %2037 = vtanh.f32 %v1500_v45  ;;  %v1481_v20 = vadd.f32 %v1480_v3, %v2419_v6  ;;  %v1494_v15 = vpop.f32.mrf.mxu3 }
 0x5c9   :  { %v1505_v60 = vmul.f32 0.5, %v1503_v57  ;;  %v1495_v6 = vadd.f32 %v1494_v15, %v2431_v47 }
 0x5ca   :  { %v1508_v40 = vadd.f32 %v1481_v20, %v408_v13 }
 0x5cb   :  { %v1517_v8 = vmul.f32 %v1505_v60, %v1493_v31 }
 0x5cc   :  { %v2036_v19 = vpop.eup %2035  ;;  %v1510_v32 = vmul.f32 0.5, %v1508_v40 }
 0x5cd   :  { %v1513_v44 = vadd.f32 1.0, %v2036_v19  ;;  %v1519_v54 = vadd.f32 %v1517_v8, %v455_v53 }
 0x5ce   :  { %v2038_v63 = vpop.eup %2037  ;;  %2039 = vtanh.f32 %v1510_v32 }
 0x5cf   :  { %2041 = vtanh.f32 %v1519_v54  ;;  %v1504_v9 = vadd.f32 1.0, %v2038_v63  ;;  %v1515_v17 = vmul.f32 0.5, %v1513_v44 }
 0x5d1   :  { %v1506_v62 = vmul.f32 0.5, %v1504_v9  ;;  %v1523_v21 = vsub.f32 1.0, %v1515_v17  ;;  %v1527_v34 = vmul.f32 %v1515_v17, %v2817_v48 }
 0x5d3   :  { %v1518_v27 = vmul.f32 %v1506_v62, %v1495_v6 }
 0x5d4   :  { %v2040_v59 = vpop.eup %2039 }
 0x5d5   :  { %v2042_v55 = vpop.eup %2041  ;;  %v1514_v25 = vadd.f32 1.0, %v2040_v59  ;;  %v1520_v50 = vadd.f32 %v1518_v27, %v457_v49 }
 0x5d6   :  { %v1525_v38 = vmul.f32 %v2042_v55, %v1523_v21 }
 0x5d7   :  { %2043 = vtanh.f32 %v1520_v50  ;;  %v1516_v2 = vmul.f32 0.5, %v1514_v25 }
 0x5d8   :  { %v1529_v42 = vadd.f32 %v1527_v34, %v1525_v38 }
 0x5d9   :  { %v1524_v18 = vsub.f32 1.0, %v1516_v2  ;;  %v1528_v12 = vmul.f32 %v1516_v2, %v2823_v33 }
 0x5da   :  { %v1545_v47 = vsel %vm1543_vm14, %v1529_v42, %v2817_v48 }
 0x5db   :  { %1557 = vst [vmem:[#allocation11] sm:$0xff] %v1545_v47 }
 0x5dd   :  { %v2044_v37 = vpop.eup %2043 }
 0x5de   :  { %v1526_v43 = vmul.f32 %v2044_v37, %v1524_v18 }
 0x5e0   :  { %v1530_v48 = vadd.f32 %v1528_v12, %v1526_v43 }
 0x5e2   :  { %v1546_v58 = vsel %vm1544_vm15, %v1530_v48, %v2823_v33 }
 0x5e3   :  { %v1931_v36 = vpack.c.bf16 %v1546_v58, %v1545_v47  ;;  %1558 = vst [vmem:[#allocation11 + $0x8] sm:$0xff] %v1546_v58 }
 0x5e4   :  { %1584 = dma.vmem_to_hbm [thread:$0]  %s1577_s5, 256, %s1579_s26, [#allocation12], %s2184_s7, %s2184_s7, %s2185_s9  }
 0x5e5   :  { %1932 = vst [vmem:[#allocation10 + $0x38] sm:$0xff] %v1931_v36  }
 0x5e6   :  { %1571 = dma.vmem_to_hbm [thread:$0]  %s1564_s28, 1024, %s1566_s8, [#allocation6], %s2177_s13, %s2177_s13, %s2178_s14  }
 0x5e7   :  { %2169 = dma.done.wait [#allocation6], 1024  }
 0x5e8   :  { %2170 = vsyncadd [#allocation6], 4294966272 }
 0x5e9   :  { %2171 = dma.done.wait [#allocation12], 256  }
 0x5ea   :  { %2172 = vsyncadd [#allocation12], 4294967040 }
 0x5eb   :  { %1593 = vsyncpa [#allocation5], 1 }
 0x5ec   :  { %1594 = vsyncpa [#allocation8], 1 }
 0x5ed   :  { %1595 = vsyncpa [#allocation6], 1 }
 0x5ee   :  { %1596 = vsyncpa [#allocation12], 1 }

</bundles_post_ra>
